<compile_context>
chip_gen: v6e
topology: v6e:2x2x1
jax: 0.10.0
libtpu: 0.0.40
codegen_flags: <defaults>
</compile_context>

<pallas_src>
import functools

import numpy as np
import jax
import jax.numpy as jnp
from jax.experimental import pallas as pl
from jax.experimental.pallas import tpu as pltpu


# --------------------------------------------------------------------------- #
# Kernel helpers
# --------------------------------------------------------------------------- #
def _channel_att(xv, w1t, w2t):
    """Channel attention for a (TB, C, HW) f32 tile.  Returns (TB, C) f32.

    Matches: sigmoid(fc(avg_pool(x)) + fc(max_pool(x))), fc = Linear-ReLU-Linear.
    """
    tb, _, hw = xv.shape
    avg = jnp.sum(xv, axis=2) * (1.0 / hw)               # (TB, C)  lane reduce
    mxc = jnp.max(xv, axis=2)                            # (TB, C)
    stats = jnp.concatenate([avg, mxc], axis=0)          # (2*TB, C) stacked MLP
    h = jnp.maximum(
        jnp.dot(stats, w1t, preferred_element_type=jnp.float32), 0.0)
    z = jnp.dot(h, w2t, preferred_element_type=jnp.float32)   # (2*TB, C)
    return jax.nn.sigmoid(z[:tb, :] + z[tb:, :])         # (TB, C)


def _att_fused_kernel(x_ref, w1t_ref, w2t_ref, cmask_ref, wconv_ref, bconv_ref,
                      out_c_ref, out_s_ref, *, width):
    # x_ref:     (TB, C, HW) VMEM block (TB batch elements, lane-dense)
    # w1t_ref:   (C, Cr)   w2t_ref: (Cr, C)   (constant VMEM blocks)
    # cmask_ref: (7, HW) f32 column-validity masks (constant VMEM block)
    # wconv_ref: (98,) f32 SMEM, flat index = ch * 49 + ki * 7 + kj
    # bconv_ref: (1,)  f32 SMEM
    # out_c_ref: (1, TB, C)    out_s_ref: (1, TB, HW)
    K = 7
    TB, C, HW = x_ref.shape
    W = width

    # x is streamed from HBM exactly once per batch tile; bf16 callers get an
    # in-register upcast (halves HBM read bytes).
    xv = x_ref[...].astype(jnp.float32)                  # (TB, C, HW)

    # ---- channel attention ------------------------------------------------ #
    out_c_ref[0] = _channel_att(
        xv, w1t_ref[...], w2t_ref[...]).astype(out_c_ref.dtype)

    # ---- spatial attention: mean/max over C, then flattened 7x7 conv ------- #
    m_flat = jnp.sum(xv, axis=1) * (1.0 / C)             # (TB, HW) torch.mean dim=1
    x_flat = jnp.max(xv, axis=1)                         # (TB, HW) torch.max dim=1

    # conv(pad=3): out[p] += w[ki,kj] * in[p + (ki-3)*W + (kj-3)].
    # Row out-of-range taps fall into the lane-aligned zero halo (aligned
    # concat only); cross-row column wrap is killed by the per-kj column mask.
    pad = max(128, -(-(3 * W + 3) // 128) * 128)         # aligned zero halo
    zpad = jnp.zeros((TB, pad), jnp.float32)
    p_m = jnp.concatenate([zpad, m_flat, zpad], axis=1)  # (TB, pad+HW+pad)
    p_x = jnp.concatenate([zpad, x_flat, zpad], axis=1)

    # 4 independent accumulator chains (mean/max x ki parity) -> VALUs pipeline
    # instead of one ~100-FMA serial dependence chain.
    accs = [jnp.zeros((TB, HW), jnp.float32) for _ in range(4)]
    for kj in range(K):
        cm = cmask_ref[kj:kj + 1, :]                     # (1, HW) in {0, 1}
        for ki in range(K):
            start = pad + (ki - 3) * W + (kj - 3)        # static offsets
            s_m = p_m[:, start:start + HW]
            s_x = p_x[:, start:start + HW]
            wm = wconv_ref[ki * K + kj]                  # mean-channel tap
            wx = wconv_ref[49 + ki * K + kj]             # max-channel tap
            accs[ki % 2] = accs[ki % 2] + (wm * cm) * s_m
            accs[2 + ki % 2] = accs[2 + ki % 2] + (wx * cm) * s_x

    conv = (accs[0] + accs[1]) + (accs[2] + accs[3]) + bconv_ref[0]
    out_s_ref[0] = jax.nn.sigmoid(conv).astype(out_s_ref.dtype)


def _channel_only_kernel(x_ref, w1t_ref, w2t_ref, out_c_ref):
    xv = x_ref[...].astype(jnp.float32)
    out_c_ref[0] = _channel_att(
        xv, w1t_ref[...], w2t_ref[...]).astype(out_c_ref.dtype)


# --------------------------------------------------------------------------- #
# Wrapper
# --------------------------------------------------------------------------- #
def _pick_tb(b, bytes_per_batch_elem, max_block_bytes=8 << 20, max_tb=8):
    """Largest divisor of b keeping >= 2 grid steps (both v7x TCs busy) and a
    bounded per-step block size."""
    best = 1
    for tb in range(1, min(b, max_tb) + 1):
        if (b % tb == 0 and tb * bytes_per_batch_elem <= max_block_bytes
                and b // tb >= 2):
            best = tb
    return best


def _vmem_limit_bytes(need_bytes):
    try:
        cap = int(getattr(pltpu.get_tpu_info(), "vmem_capacity_bytes",
                          128 << 20))
    except Exception:
        cap = 64 << 20          # v7x per-TensorCore physical VMEM (safe floor)
    return int(min(max(need_bytes, 32 << 20), (cap * 3) // 4))


def att_layer_forward(x, w1, w2, w_conv=None, b_conv=None, with_spatial=True):
    """ATTLayer forward.  x: (B, C, H, W); w1: (C//r, C); w2: (C, C//r)
    (PyTorch nn.Linear layout); w_conv: (1, 2, 7, 7) OIHW; b_conv: (1,)."""
    b, c, h, w = x.shape
    hw = h * w
    cr = w1.shape[0]
    w1t = jnp.asarray(w1, jnp.float32).T                 # (C, Cr)
    w2t = jnp.asarray(w2, jnp.float32).T                 # (Cr, C)

    # Lane-dense layout: flatten H*W onto the lane axis (free row-major view).
    x_flat = x.reshape(b, c, hw)

    tb = _pick_tb(b, c * hw * x.dtype.itemsize)
    g = b // tb

    need = (2 * tb * c * hw * x.dtype.itemsize           # double-buffered x
            + tb * c * hw * 4                            # in-register f32 copy
            + 2 * (2 * c * cr + 7 * hw + tb * c + tb * hw) * 4
            + (8 << 20))
    cparams = pltpu.CompilerParams(
        dimension_semantics=("parallel",),
        vmem_limit_bytes=_vmem_limit_bytes(need))

    if not with_spatial:
        out_c = pl.pallas_call(
            _channel_only_kernel,
            out_shape=jax.ShapeDtypeStruct((g, tb, c), jnp.float32),
            grid_spec=pltpu.PrefetchScalarGridSpec(
                num_scalar_prefetch=0,
                grid=(g,),
                in_specs=[
                    pl.BlockSpec((tb, c, hw), lambda i: (i, 0, 0)),
                    pl.BlockSpec((c, cr), lambda i: (0, 0)),
                    pl.BlockSpec((cr, c), lambda i: (0, 0)),
                ],
                out_specs=pl.BlockSpec((1, tb, c), lambda i: (i, 0, 0)),
            ),
            compiler_params=cparams,
        )(x_flat, w1t, w2t)
        return out_c.reshape(b, c, 1, 1)

    # Host-side constants: per-kj column-validity mask for the flattened conv
    # (depends only on static H, W) and flattened conv parameters as traced
    # SMEM inputs (no recompiles when weights change).
    j_idx = np.arange(hw) % w
    cmask = np.stack(
        [((j_idx + kj - 3 >= 0) & (j_idx + kj - 3 < w)) for kj in range(7)],
        axis=0).astype(np.float32)
    cmask = jnp.asarray(cmask)                           # (7, HW)
    wconv_flat = jnp.asarray(w_conv, jnp.float32).reshape(2 * 7 * 7)
    bconv = jnp.asarray(b_conv, jnp.float32).reshape(1)

    kernel = functools.partial(_att_fused_kernel, width=w)
    out_c, out_s = pl.pallas_call(
        kernel,
        out_shape=(
            jax.ShapeDtypeStruct((g, tb, c), jnp.float32),
            jax.ShapeDtypeStruct((g, tb, hw), jnp.float32),
        ),
        grid_spec=pltpu.PrefetchScalarGridSpec(
            num_scalar_prefetch=0,
            grid=(g,),
            in_specs=[
                pl.BlockSpec((tb, c, hw), lambda i: (i, 0, 0)),
                pl.BlockSpec((c, cr), lambda i: (0, 0)),
                pl.BlockSpec((cr, c), lambda i: (0, 0)),
                pl.BlockSpec((7, hw), lambda i: (0, 0)),
                pl.BlockSpec(memory_space=pltpu.MemorySpace.SMEM),
                pl.BlockSpec(memory_space=pltpu.MemorySpace.SMEM),
            ],
            out_specs=[
                pl.BlockSpec((1, tb, c), lambda i: (i, 0, 0)),
                pl.BlockSpec((1, tb, hw), lambda i: (i, 0, 0)),
            ],
        ),
        compiler_params=cparams,
    )(x_flat, w1t, w2t, cmask, wconv_flat, bconv)
    return out_c.reshape(b, c, 1, 1), out_s.reshape(b, 1, h, w)


# --------------------------------------------------------------------------- #
# Pure-JAX reference
# --------------------------------------------------------------------------- #
def ref_forward(x, w1, w2, w_conv, b_conv):
    b, c, h, w = x.shape
    y1 = jnp.mean(x, axis=(2, 3))
    y2 = jnp.max(x, axis=(2, 3))

    def fc(y):
        return jnp.maximum(y @ w1.T, 0.0) @ w2.T

    att_c = jax.nn.sigmoid(fc(y1) + fc(y2)).reshape(b, c, 1, 1)
    ym = jnp.mean(x, axis=1, keepdims=True)
    yx = jnp.max(x, axis=1, keepdims=True)
    ycat = jnp.concatenate([ym, yx], axis=1)
    conv = jax.lax.conv_general_dilated(
        ycat, w_conv, window_strides=(1, 1), padding=[(3, 3), (3, 3)],
        dimension_numbers=("NCHW", "OIHW", "NCHW"))
    att_s = jax.nn.sigmoid(conv + b_conv.reshape(1, 1, 1, 1))
    return att_c, att_s


if __name__ == "__main__":
    # channel must be >= reduction so that channel // reduction >= 1
    b, c, h, w = 2, 32, 16, 16
    reduction = 16
    cr = c // reduction

    key = jax.random.PRNGKey(0)
    k1, k2, k3, k4, k5 = jax.random.split(key, 5)
    x = jax.random.normal(k1, (b, c, h, w), jnp.float32)
    w1 = jax.random.normal(k2, (cr, c), jnp.float32) * 0.1            # fc[0].weight
    w2 = jax.random.normal(k3, (c, cr), jnp.float32) * 0.1            # fc[2].weight
    w_conv = jax.random.normal(k4, (1, 2, 7, 7), jnp.float32) * 0.1   # Conv2d(2,1,7)
    b_conv = jax.random.normal(k5, (1,), jnp.float32) * 0.1

    fwd = jax.jit(lambda *a: att_layer_forward(*a, with_spatial=True))
    att_c, att_s = fwd(x, w1, w2, w_conv, b_conv)
    jax.block_until_ready((att_c, att_s))

    ref_c, ref_s = ref_forward(x, w1, w2, w_conv, b_conv)
    assert att_c.shape == (b, c, 1, 1) and att_s.shape == (b, 1, h, w)
    assert np.allclose(np.asarray(att_c), np.asarray(ref_c), atol=1e-5, rtol=1e-5)
    assert np.allclose(np.asarray(att_s), np.asarray(ref_s), atol=1e-5, rtol=1e-5)

    att_c_only = att_layer_forward(x, w1, w2, with_spatial=False)
    jax.block_until_ready(att_c_only)
    assert np.allclose(np.asarray(att_c_only), np.asarray(ref_c),
                       atol=1e-5, rtol=1e-5)
    print("KERNEL_OK")
</pallas_src>

<mosaic_0001>
module attributes {stable_mosaic.version = 11 : i64} {
  func.func @_att_fused_kernel(%arg0: i32, %arg1: memref<1x32x256xf32, #tpu.memory_space<vmem>>, %arg2: memref<32x2xf32, #tpu.memory_space<vmem>>, %arg3: memref<2x32xf32, #tpu.memory_space<vmem>>, %arg4: memref<7x256xf32, #tpu.memory_space<vmem>>, %arg5: memref<98xf32, #tpu.memory_space<smem>>, %arg6: memref<1xf32, #tpu.memory_space<smem>>, %arg7: memref<1x1x32xf32, #tpu.memory_space<vmem>>, %arg8: memref<1x1x256xf32, #tpu.memory_space<vmem>>) attributes {dimension_semantics = [#tpu.dimension_semantics<parallel>], iteration_bounds = array<i64: 2>, scalar_prefetch = 0 : i64, scratch_operands = 0 : i64, tpu.core_type = #tpu.core_type<tc>, window_params = [{transform_indices = @transform_0, window_bounds = array<i64: 1, 32, 256>}, {pipeline_mode = #tpu.pipeline_mode<synchronous>, transform_indices = @transform_1, window_bounds = array<i64: 32, 2>}, {pipeline_mode = #tpu.pipeline_mode<synchronous>, transform_indices = @transform_2, window_bounds = array<i64: 2, 32>}, {pipeline_mode = #tpu.pipeline_mode<synchronous>, transform_indices = @transform_3, window_bounds = array<i64: 7, 256>}, {transform_indices = @transform_4, window_bounds = array<i64: 98>}, {transform_indices = @transform_5, window_bounds = array<i64: 1>}, {transform_indices = @transform_6, window_bounds = array<i64: 1, 1, 32>}, {transform_indices = @transform_7, window_bounds = array<i64: 1, 1, 256>}]} {
    %c0 = arith.constant 0 : index
    %c0_0 = arith.constant 0 : index
    %c0_1 = arith.constant 0 : index
    %0 = vector.load %arg1[%c0, %c0_0, %c0_1] : memref<1x32x256xf32, #tpu.memory_space<vmem>>, vector<1x32x256xf32>
    %c0_2 = arith.constant 0 : index
    %c0_3 = arith.constant 0 : index
    %1 = vector.load %arg2[%c0_2, %c0_3] : memref<32x2xf32, #tpu.memory_space<vmem>>, vector<32x2xf32>
    %c0_4 = arith.constant 0 : index
    %c0_5 = arith.constant 0 : index
    %2 = vector.load %arg3[%c0_4, %c0_5] : memref<2x32xf32, #tpu.memory_space<vmem>>, vector<2x32xf32>
    %cst = arith.constant dense<0.000000e+00> : vector<1x32xf32>
    %3 = vector.multi_reduction <add>, %0, %cst [2] : vector<1x32x256xf32> to vector<1x32xf32>
    %cst_6 = arith.constant 3.906250e-03 : f32
    %4 = vector.broadcast %cst_6 : f32 to vector<1x32xf32>
    %5 = arith.mulf %3, %4 : vector<1x32xf32>
    %cst_7 = arith.constant dense<0xFF800000> : vector<1x32xf32>
    %6 = vector.multi_reduction <maximumf>, %0, %cst_7 [2] : vector<1x32x256xf32> to vector<1x32xf32>
    %7 = tpu.concatenate %5, %6 in 0 : vector<1x32xf32>, vector<1x32xf32> -> vector<2x32xf32>
    %cst_8 = arith.constant dense<0.000000e+00> : vector<2x2xf32>
    %8 = tpu.matmul %7, %1, %cst_8 {dimension_numbers = #tpu.dot_dimension_numbers<[1], [0], [0], [1], [0, 0, 1, 1], [], []>} : vector<2x32xf32>, vector<32x2xf32>, vector<2x2xf32> -> vector<2x2xf32>
    %cst_9 = arith.constant 0.000000e+00 : f32
    %9 = vector.broadcast %cst_9 : f32 to vector<2x2xf32>
    %10 = arith.maximumf %8, %9 : vector<2x2xf32>
    %cst_10 = arith.constant dense<0.000000e+00> : vector<2x32xf32>
    %11 = tpu.matmul %10, %2, %cst_10 {dimension_numbers = #tpu.dot_dimension_numbers<[1], [0], [0], [1], [0, 0, 1, 1], [], []>} : vector<2x2xf32>, vector<2x32xf32>, vector<2x32xf32> -> vector<2x32xf32>
    %12 = vector.extract_strided_slice %11 {offsets = [0, 0], sizes = [1, 32], strides = [1, 1]} : vector<2x32xf32> to vector<1x32xf32>
    %13 = vector.extract_strided_slice %11 {offsets = [1, 0], sizes = [1, 32], strides = [1, 1]} : vector<2x32xf32> to vector<1x32xf32>
    %14 = arith.addf %12, %13 : vector<1x32xf32>
    %15 = arith.negf %14 : vector<1x32xf32>
    %16 = math.exp %15 : vector<1x32xf32>
    %cst_11 = arith.constant 1.000000e+00 : f32
    %17 = vector.broadcast %cst_11 : f32 to vector<1x32xf32>
    %18 = arith.addf %17, %16 : vector<1x32xf32>
    %19 = arith.divf %17, %18 : vector<1x32xf32>
    %c0_12 = arith.constant 0 : index
    %c0_13 = arith.constant 0 : index
    %c0_14 = arith.constant 0 : index
    %20 = vector.load %arg7[%c0_12, %c0_13, %c0_14] : memref<1x1x32xf32, #tpu.memory_space<vmem>>, vector<1x1x32xf32>
    %21 = vector.shape_cast %20 : vector<1x1x32xf32> to vector<1x32xf32>
    %22 = vector.shape_cast %19 : vector<1x32xf32> to vector<1x1x32xf32>
    tpu.vector_store %arg7[%c0_12, %c0_13, %c0_14], %22 {strides = array<i32>} : memref<1x1x32xf32, #tpu.memory_space<vmem>>, vector<1x1x32xf32>,
    %cst_15 = arith.constant dense<0.000000e+00> : vector<1x256xf32>
    %23 = vector.multi_reduction <add>, %0, %cst_15 [1] : vector<1x32x256xf32> to vector<1x256xf32>
    %cst_16 = arith.constant 3.125000e-02 : f32
    %24 = vector.broadcast %cst_16 : f32 to vector<1x256xf32>
    %25 = arith.mulf %23, %24 : vector<1x256xf32>
    %cst_17 = arith.constant dense<0xFF800000> : vector<1x256xf32>
    %26 = vector.multi_reduction <maximumf>, %0, %cst_17 [1] : vector<1x32x256xf32> to vector<1x256xf32>
    %cst_18 = arith.constant 0.000000e+00 : f32
    %27 = vector.broadcast %cst_18 : f32 to vector<1x128xf32>
    %28 = tpu.concatenate %27, %25, %27 in 1 : vector<1x128xf32>, vector<1x256xf32>, vector<1x128xf32> -> vector<1x512xf32>
    %29 = tpu.concatenate %27, %26, %27 in 1 : vector<1x128xf32>, vector<1x256xf32>, vector<1x128xf32> -> vector<1x512xf32>
    %cst_19 = arith.constant 0.000000e+00 : f32
    %30 = vector.broadcast %cst_19 : f32 to vector<1x256xf32>
    %cst_20 = arith.constant 0.000000e+00 : f32
    %31 = vector.broadcast %cst_20 : f32 to vector<1x256xf32>
    %cst_21 = arith.constant 0.000000e+00 : f32
    %32 = vector.broadcast %cst_21 : f32 to vector<1x256xf32>
    %cst_22 = arith.constant 0.000000e+00 : f32
    %33 = vector.broadcast %cst_22 : f32 to vector<1x256xf32>
    %c0_23 = arith.constant 0 : index
    %c0_24 = arith.constant 0 : index
    %34 = vector.load %arg4[%c0_23, %c0_24] : memref<7x256xf32, #tpu.memory_space<vmem>>, vector<1x256xf32>
    %35 = vector.extract_strided_slice %28 {offsets = [0, 77], sizes = [1, 256], strides = [1, 1]} : vector<1x512xf32> to vector<1x256xf32>
    %36 = vector.extract_strided_slice %29 {offsets = [0, 77], sizes = [1, 256], strides = [1, 1]} : vector<1x512xf32> to vector<1x256xf32>
    %c0_25 = arith.constant 0 : index
    %37 = memref.load %arg5[%c0_25] : memref<98xf32, #tpu.memory_space<smem>>
    %c49 = arith.constant 49 : index
    %38 = memref.load %arg5[%c49] : memref<98xf32, #tpu.memory_space<smem>>
    %39 = vector.broadcast %37 : f32 to vector<1x256xf32>
    %40 = arith.mulf %39, %34 : vector<1x256xf32>
    %41 = arith.mulf %40, %35 : vector<1x256xf32>
    %42 = arith.addf %30, %41 : vector<1x256xf32>
    %43 = vector.broadcast %38 : f32 to vector<1x256xf32>
    %44 = arith.mulf %43, %34 : vector<1x256xf32>
    %45 = arith.mulf %44, %36 : vector<1x256xf32>
    %46 = arith.addf %32, %45 : vector<1x256xf32>
    %47 = vector.extract_strided_slice %28 {offsets = [0, 93], sizes = [1, 256], strides = [1, 1]} : vector<1x512xf32> to vector<1x256xf32>
    %48 = vector.extract_strided_slice %29 {offsets = [0, 93], sizes = [1, 256], strides = [1, 1]} : vector<1x512xf32> to vector<1x256xf32>
    %c7 = arith.constant 7 : index
    %49 = memref.load %arg5[%c7] : memref<98xf32, #tpu.memory_space<smem>>
    %c56 = arith.constant 56 : index
    %50 = memref.load %arg5[%c56] : memref<98xf32, #tpu.memory_space<smem>>
    %51 = vector.broadcast %49 : f32 to vector<1x256xf32>
    %52 = arith.mulf %51, %34 : vector<1x256xf32>
    %53 = arith.mulf %52, %47 : vector<1x256xf32>
    %54 = arith.addf %31, %53 : vector<1x256xf32>
    %55 = vector.broadcast %50 : f32 to vector<1x256xf32>
    %56 = arith.mulf %55, %34 : vector<1x256xf32>
    %57 = arith.mulf %56, %48 : vector<1x256xf32>
    %58 = arith.addf %33, %57 : vector<1x256xf32>
    %59 = vector.extract_strided_slice %28 {offsets = [0, 109], sizes = [1, 256], strides = [1, 1]} : vector<1x512xf32> to vector<1x256xf32>
    %60 = vector.extract_strided_slice %29 {offsets = [0, 109], sizes = [1, 256], strides = [1, 1]} : vector<1x512xf32> to vector<1x256xf32>
    %c14 = arith.constant 14 : index
    %61 = memref.load %arg5[%c14] : memref<98xf32, #tpu.memory_space<smem>>
    %c63 = arith.constant 63 : index
    %62 = memref.load %arg5[%c63] : memref<98xf32, #tpu.memory_space<smem>>
    %63 = vector.broadcast %61 : f32 to vector<1x256xf32>
    %64 = arith.mulf %63, %34 : vector<1x256xf32>
    %65 = arith.mulf %64, %59 : vector<1x256xf32>
    %66 = arith.addf %42, %65 : vector<1x256xf32>
    %67 = vector.broadcast %62 : f32 to vector<1x256xf32>
    %68 = arith.mulf %67, %34 : vector<1x256xf32>
    %69 = arith.mulf %68, %60 : vector<1x256xf32>
    %70 = arith.addf %46, %69 : vector<1x256xf32>
    %71 = vector.extract_strided_slice %28 {offsets = [0, 125], sizes = [1, 256], strides = [1, 1]} : vector<1x512xf32> to vector<1x256xf32>
    %72 = vector.extract_strided_slice %29 {offsets = [0, 125], sizes = [1, 256], strides = [1, 1]} : vector<1x512xf32> to vector<1x256xf32>
    %c21 = arith.constant 21 : index
    %73 = memref.load %arg5[%c21] : memref<98xf32, #tpu.memory_space<smem>>
    %c70 = arith.constant 70 : index
    %74 = memref.load %arg5[%c70] : memref<98xf32, #tpu.memory_space<smem>>
    %75 = vector.broadcast %73 : f32 to vector<1x256xf32>
    %76 = arith.mulf %75, %34 : vector<1x256xf32>
    %77 = arith.mulf %76, %71 : vector<1x256xf32>
    %78 = arith.addf %54, %77 : vector<1x256xf32>
    %79 = vector.broadcast %74 : f32 to vector<1x256xf32>
    %80 = arith.mulf %79, %34 : vector<1x256xf32>
    %81 = arith.mulf %80, %72 : vector<1x256xf32>
    %82 = arith.addf %58, %81 : vector<1x256xf32>
    %83 = vector.extract_strided_slice %28 {offsets = [0, 141], sizes = [1, 256], strides = [1, 1]} : vector<1x512xf32> to vector<1x256xf32>
    %84 = vector.extract_strided_slice %29 {offsets = [0, 141], sizes = [1, 256], strides = [1, 1]} : vector<1x512xf32> to vector<1x256xf32>
    %c28 = arith.constant 28 : index
    %85 = memref.load %arg5[%c28] : memref<98xf32, #tpu.memory_space<smem>>
    %c77 = arith.constant 77 : index
    %86 = memref.load %arg5[%c77] : memref<98xf32, #tpu.memory_space<smem>>
    %87 = vector.broadcast %85 : f32 to vector<1x256xf32>
    %88 = arith.mulf %87, %34 : vector<1x256xf32>
    %89 = arith.mulf %88, %83 : vector<1x256xf32>
    %90 = arith.addf %66, %89 : vector<1x256xf32>
    %91 = vector.broadcast %86 : f32 to vector<1x256xf32>
    %92 = arith.mulf %91, %34 : vector<1x256xf32>
    %93 = arith.mulf %92, %84 : vector<1x256xf32>
    %94 = arith.addf %70, %93 : vector<1x256xf32>
    %95 = vector.extract_strided_slice %28 {offsets = [0, 157], sizes = [1, 256], strides = [1, 1]} : vector<1x512xf32> to vector<1x256xf32>
    %96 = vector.extract_strided_slice %29 {offsets = [0, 157], sizes = [1, 256], strides = [1, 1]} : vector<1x512xf32> to vector<1x256xf32>
    %c35 = arith.constant 35 : index
    %97 = memref.load %arg5[%c35] : memref<98xf32, #tpu.memory_space<smem>>
    %c84 = arith.constant 84 : index
    %98 = memref.load %arg5[%c84] : memref<98xf32, #tpu.memory_space<smem>>
    %99 = vector.broadcast %97 : f32 to vector<1x256xf32>
    %100 = arith.mulf %99, %34 : vector<1x256xf32>
    %101 = arith.mulf %100, %95 : vector<1x256xf32>
    %102 = arith.addf %78, %101 : vector<1x256xf32>
    %103 = vector.broadcast %98 : f32 to vector<1x256xf32>
    %104 = arith.mulf %103, %34 : vector<1x256xf32>
    %105 = arith.mulf %104, %96 : vector<1x256xf32>
    %106 = arith.addf %82, %105 : vector<1x256xf32>
    %107 = vector.extract_strided_slice %28 {offsets = [0, 173], sizes = [1, 256], strides = [1, 1]} : vector<1x512xf32> to vector<1x256xf32>
    %108 = vector.extract_strided_slice %29 {offsets = [0, 173], sizes = [1, 256], strides = [1, 1]} : vector<1x512xf32> to vector<1x256xf32>
    %c42 = arith.constant 42 : index
    %109 = memref.load %arg5[%c42] : memref<98xf32, #tpu.memory_space<smem>>
    %c91 = arith.constant 91 : index
    %110 = memref.load %arg5[%c91] : memref<98xf32, #tpu.memory_space<smem>>
    %111 = vector.broadcast %109 : f32 to vector<1x256xf32>
    %112 = arith.mulf %111, %34 : vector<1x256xf32>
    %113 = arith.mulf %112, %107 : vector<1x256xf32>
    %114 = arith.addf %90, %113 : vector<1x256xf32>
    %115 = vector.broadcast %110 : f32 to vector<1x256xf32>
    %116 = arith.mulf %115, %34 : vector<1x256xf32>
    %117 = arith.mulf %116, %108 : vector<1x256xf32>
    %118 = arith.addf %94, %117 : vector<1x256xf32>
    %c1 = arith.constant 1 : index
    %c0_26 = arith.constant 0 : index
    %119 = vector.load %arg4[%c1, %c0_26] : memref<7x256xf32, #tpu.memory_space<vmem>>, vector<1x256xf32>
    %120 = vector.extract_strided_slice %28 {offsets = [0, 78], sizes = [1, 256], strides = [1, 1]} : vector<1x512xf32> to vector<1x256xf32>
    %121 = vector.extract_strided_slice %29 {offsets = [0, 78], sizes = [1, 256], strides = [1, 1]} : vector<1x512xf32> to vector<1x256xf32>
    %c1_27 = arith.constant 1 : index
    %122 = memref.load %arg5[%c1_27] : memref<98xf32, #tpu.memory_space<smem>>
    %c50 = arith.constant 50 : index
    %123 = memref.load %arg5[%c50] : memref<98xf32, #tpu.memory_space<smem>>
    %124 = vector.broadcast %122 : f32 to vector<1x256xf32>
    %125 = arith.mulf %124, %119 : vector<1x256xf32>
    %126 = arith.mulf %125, %120 : vector<1x256xf32>
    %127 = arith.addf %114, %126 : vector<1x256xf32>
    %128 = vector.broadcast %123 : f32 to vector<1x256xf32>
    %129 = arith.mulf %128, %119 : vector<1x256xf32>
    %130 = arith.mulf %129, %121 : vector<1x256xf32>
    %131 = arith.addf %118, %130 : vector<1x256xf32>
    %132 = vector.extract_strided_slice %28 {offsets = [0, 94], sizes = [1, 256], strides = [1, 1]} : vector<1x512xf32> to vector<1x256xf32>
    %133 = vector.extract_strided_slice %29 {offsets = [0, 94], sizes = [1, 256], strides = [1, 1]} : vector<1x512xf32> to vector<1x256xf32>
    %c8 = arith.constant 8 : index
    %134 = memref.load %arg5[%c8] : memref<98xf32, #tpu.memory_space<smem>>
    %c57 = arith.constant 57 : index
    %135 = memref.load %arg5[%c57] : memref<98xf32, #tpu.memory_space<smem>>
    %136 = vector.broadcast %134 : f32 to vector<1x256xf32>
    %137 = arith.mulf %136, %119 : vector<1x256xf32>
    %138 = arith.mulf %137, %132 : vector<1x256xf32>
    %139 = arith.addf %102, %138 : vector<1x256xf32>
    %140 = vector.broadcast %135 : f32 to vector<1x256xf32>
    %141 = arith.mulf %140, %119 : vector<1x256xf32>
    %142 = arith.mulf %141, %133 : vector<1x256xf32>
    %143 = arith.addf %106, %142 : vector<1x256xf32>
    %144 = vector.extract_strided_slice %28 {offsets = [0, 110], sizes = [1, 256], strides = [1, 1]} : vector<1x512xf32> to vector<1x256xf32>
    %145 = vector.extract_strided_slice %29 {offsets = [0, 110], sizes = [1, 256], strides = [1, 1]} : vector<1x512xf32> to vector<1x256xf32>
    %c15 = arith.constant 15 : index
    %146 = memref.load %arg5[%c15] : memref<98xf32, #tpu.memory_space<smem>>
    %c64 = arith.constant 64 : index
    %147 = memref.load %arg5[%c64] : memref<98xf32, #tpu.memory_space<smem>>
    %148 = vector.broadcast %146 : f32 to vector<1x256xf32>
    %149 = arith.mulf %148, %119 : vector<1x256xf32>
    %150 = arith.mulf %149, %144 : vector<1x256xf32>
    %151 = arith.addf %127, %150 : vector<1x256xf32>
    %152 = vector.broadcast %147 : f32 to vector<1x256xf32>
    %153 = arith.mulf %152, %119 : vector<1x256xf32>
    %154 = arith.mulf %153, %145 : vector<1x256xf32>
    %155 = arith.addf %131, %154 : vector<1x256xf32>
    %156 = vector.extract_strided_slice %28 {offsets = [0, 126], sizes = [1, 256], strides = [1, 1]} : vector<1x512xf32> to vector<1x256xf32>
    %157 = vector.extract_strided_slice %29 {offsets = [0, 126], sizes = [1, 256], strides = [1, 1]} : vector<1x512xf32> to vector<1x256xf32>
    %c22 = arith.constant 22 : index
    %158 = memref.load %arg5[%c22] : memref<98xf32, #tpu.memory_space<smem>>
    %c71 = arith.constant 71 : index
    %159 = memref.load %arg5[%c71] : memref<98xf32, #tpu.memory_space<smem>>
    %160 = vector.broadcast %158 : f32 to vector<1x256xf32>
    %161 = arith.mulf %160, %119 : vector<1x256xf32>
    %162 = arith.mulf %161, %156 : vector<1x256xf32>
    %163 = arith.addf %139, %162 : vector<1x256xf32>
    %164 = vector.broadcast %159 : f32 to vector<1x256xf32>
    %165 = arith.mulf %164, %119 : vector<1x256xf32>
    %166 = arith.mulf %165, %157 : vector<1x256xf32>
    %167 = arith.addf %143, %166 : vector<1x256xf32>
    %168 = vector.extract_strided_slice %28 {offsets = [0, 142], sizes = [1, 256], strides = [1, 1]} : vector<1x512xf32> to vector<1x256xf32>
    %169 = vector.extract_strided_slice %29 {offsets = [0, 142], sizes = [1, 256], strides = [1, 1]} : vector<1x512xf32> to vector<1x256xf32>
    %c29 = arith.constant 29 : index
    %170 = memref.load %arg5[%c29] : memref<98xf32, #tpu.memory_space<smem>>
    %c78 = arith.constant 78 : index
    %171 = memref.load %arg5[%c78] : memref<98xf32, #tpu.memory_space<smem>>
    %172 = vector.broadcast %170 : f32 to vector<1x256xf32>
    %173 = arith.mulf %172, %119 : vector<1x256xf32>
    %174 = arith.mulf %173, %168 : vector<1x256xf32>
    %175 = arith.addf %151, %174 : vector<1x256xf32>
    %176 = vector.broadcast %171 : f32 to vector<1x256xf32>
    %177 = arith.mulf %176, %119 : vector<1x256xf32>
    %178 = arith.mulf %177, %169 : vector<1x256xf32>
    %179 = arith.addf %155, %178 : vector<1x256xf32>
    %180 = vector.extract_strided_slice %28 {offsets = [0, 158], sizes = [1, 256], strides = [1, 1]} : vector<1x512xf32> to vector<1x256xf32>
    %181 = vector.extract_strided_slice %29 {offsets = [0, 158], sizes = [1, 256], strides = [1, 1]} : vector<1x512xf32> to vector<1x256xf32>
    %c36 = arith.constant 36 : index
    %182 = memref.load %arg5[%c36] : memref<98xf32, #tpu.memory_space<smem>>
    %c85 = arith.constant 85 : index
    %183 = memref.load %arg5[%c85] : memref<98xf32, #tpu.memory_space<smem>>
    %184 = vector.broadcast %182 : f32 to vector<1x256xf32>
    %185 = arith.mulf %184, %119 : vector<1x256xf32>
    %186 = arith.mulf %185, %180 : vector<1x256xf32>
    %187 = arith.addf %163, %186 : vector<1x256xf32>
    %188 = vector.broadcast %183 : f32 to vector<1x256xf32>
    %189 = arith.mulf %188, %119 : vector<1x256xf32>
    %190 = arith.mulf %189, %181 : vector<1x256xf32>
    %191 = arith.addf %167, %190 : vector<1x256xf32>
    %192 = vector.extract_strided_slice %28 {offsets = [0, 174], sizes = [1, 256], strides = [1, 1]} : vector<1x512xf32> to vector<1x256xf32>
    %193 = vector.extract_strided_slice %29 {offsets = [0, 174], sizes = [1, 256], strides = [1, 1]} : vector<1x512xf32> to vector<1x256xf32>
    %c43 = arith.constant 43 : index
    %194 = memref.load %arg5[%c43] : memref<98xf32, #tpu.memory_space<smem>>
    %c92 = arith.constant 92 : index
    %195 = memref.load %arg5[%c92] : memref<98xf32, #tpu.memory_space<smem>>
    %196 = vector.broadcast %194 : f32 to vector<1x256xf32>
    %197 = arith.mulf %196, %119 : vector<1x256xf32>
    %198 = arith.mulf %197, %192 : vector<1x256xf32>
    %199 = arith.addf %175, %198 : vector<1x256xf32>
    %200 = vector.broadcast %195 : f32 to vector<1x256xf32>
    %201 = arith.mulf %200, %119 : vector<1x256xf32>
    %202 = arith.mulf %201, %193 : vector<1x256xf32>
    %203 = arith.addf %179, %202 : vector<1x256xf32>
    %c2 = arith.constant 2 : index
    %c0_28 = arith.constant 0 : index
    %204 = vector.load %arg4[%c2, %c0_28] : memref<7x256xf32, #tpu.memory_space<vmem>>, vector<1x256xf32>
    %205 = vector.extract_strided_slice %28 {offsets = [0, 79], sizes = [1, 256], strides = [1, 1]} : vector<1x512xf32> to vector<1x256xf32>
    %206 = vector.extract_strided_slice %29 {offsets = [0, 79], sizes = [1, 256], strides = [1, 1]} : vector<1x512xf32> to vector<1x256xf32>
    %c2_29 = arith.constant 2 : index
    %207 = memref.load %arg5[%c2_29] : memref<98xf32, #tpu.memory_space<smem>>
    %c51 = arith.constant 51 : index
    %208 = memref.load %arg5[%c51] : memref<98xf32, #tpu.memory_space<smem>>
    %209 = vector.broadcast %207 : f32 to vector<1x256xf32>
    %210 = arith.mulf %209, %204 : vector<1x256xf32>
    %211 = arith.mulf %210, %205 : vector<1x256xf32>
    %212 = arith.addf %199, %211 : vector<1x256xf32>
    %213 = vector.broadcast %208 : f32 to vector<1x256xf32>
    %214 = arith.mulf %213, %204 : vector<1x256xf32>
    %215 = arith.mulf %214, %206 : vector<1x256xf32>
    %216 = arith.addf %203, %215 : vector<1x256xf32>
    %217 = vector.extract_strided_slice %28 {offsets = [0, 95], sizes = [1, 256], strides = [1, 1]} : vector<1x512xf32> to vector<1x256xf32>
    %218 = vector.extract_strided_slice %29 {offsets = [0, 95], sizes = [1, 256], strides = [1, 1]} : vector<1x512xf32> to vector<1x256xf32>
    %c9 = arith.constant 9 : index
    %219 = memref.load %arg5[%c9] : memref<98xf32, #tpu.memory_space<smem>>
    %c58 = arith.constant 58 : index
    %220 = memref.load %arg5[%c58] : memref<98xf32, #tpu.memory_space<smem>>
    %221 = vector.broadcast %219 : f32 to vector<1x256xf32>
    %222 = arith.mulf %221, %204 : vector<1x256xf32>
    %223 = arith.mulf %222, %217 : vector<1x256xf32>
    %224 = arith.addf %187, %223 : vector<1x256xf32>
    %225 = vector.broadcast %220 : f32 to vector<1x256xf32>
    %226 = arith.mulf %225, %204 : vector<1x256xf32>
    %227 = arith.mulf %226, %218 : vector<1x256xf32>
    %228 = arith.addf %191, %227 : vector<1x256xf32>
    %229 = vector.extract_strided_slice %28 {offsets = [0, 111], sizes = [1, 256], strides = [1, 1]} : vector<1x512xf32> to vector<1x256xf32>
    %230 = vector.extract_strided_slice %29 {offsets = [0, 111], sizes = [1, 256], strides = [1, 1]} : vector<1x512xf32> to vector<1x256xf32>
    %c16 = arith.constant 16 : index
    %231 = memref.load %arg5[%c16] : memref<98xf32, #tpu.memory_space<smem>>
    %c65 = arith.constant 65 : index
    %232 = memref.load %arg5[%c65] : memref<98xf32, #tpu.memory_space<smem>>
    %233 = vector.broadcast %231 : f32 to vector<1x256xf32>
    %234 = arith.mulf %233, %204 : vector<1x256xf32>
    %235 = arith.mulf %234, %229 : vector<1x256xf32>
    %236 = arith.addf %212, %235 : vector<1x256xf32>
    %237 = vector.broadcast %232 : f32 to vector<1x256xf32>
    %238 = arith.mulf %237, %204 : vector<1x256xf32>
    %239 = arith.mulf %238, %230 : vector<1x256xf32>
    %240 = arith.addf %216, %239 : vector<1x256xf32>
    %241 = vector.extract_strided_slice %28 {offsets = [0, 127], sizes = [1, 256], strides = [1, 1]} : vector<1x512xf32> to vector<1x256xf32>
    %242 = vector.extract_strided_slice %29 {offsets = [0, 127], sizes = [1, 256], strides = [1, 1]} : vector<1x512xf32> to vector<1x256xf32>
    %c23 = arith.constant 23 : index
    %243 = memref.load %arg5[%c23] : memref<98xf32, #tpu.memory_space<smem>>
    %c72 = arith.constant 72 : index
    %244 = memref.load %arg5[%c72] : memref<98xf32, #tpu.memory_space<smem>>
    %245 = vector.broadcast %243 : f32 to vector<1x256xf32>
    %246 = arith.mulf %245, %204 : vector<1x256xf32>
    %247 = arith.mulf %246, %241 : vector<1x256xf32>
    %248 = arith.addf %224, %247 : vector<1x256xf32>
    %249 = vector.broadcast %244 : f32 to vector<1x256xf32>
    %250 = arith.mulf %249, %204 : vector<1x256xf32>
    %251 = arith.mulf %250, %242 : vector<1x256xf32>
    %252 = arith.addf %228, %251 : vector<1x256xf32>
    %253 = vector.extract_strided_slice %28 {offsets = [0, 143], sizes = [1, 256], strides = [1, 1]} : vector<1x512xf32> to vector<1x256xf32>
    %254 = vector.extract_strided_slice %29 {offsets = [0, 143], sizes = [1, 256], strides = [1, 1]} : vector<1x512xf32> to vector<1x256xf32>
    %c30 = arith.constant 30 : index
    %255 = memref.load %arg5[%c30] : memref<98xf32, #tpu.memory_space<smem>>
    %c79 = arith.constant 79 : index
    %256 = memref.load %arg5[%c79] : memref<98xf32, #tpu.memory_space<smem>>
    %257 = vector.broadcast %255 : f32 to vector<1x256xf32>
    %258 = arith.mulf %257, %204 : vector<1x256xf32>
    %259 = arith.mulf %258, %253 : vector<1x256xf32>
    %260 = arith.addf %236, %259 : vector<1x256xf32>
    %261 = vector.broadcast %256 : f32 to vector<1x256xf32>
    %262 = arith.mulf %261, %204 : vector<1x256xf32>
    %263 = arith.mulf %262, %254 : vector<1x256xf32>
    %264 = arith.addf %240, %263 : vector<1x256xf32>
    %265 = vector.extract_strided_slice %28 {offsets = [0, 159], sizes = [1, 256], strides = [1, 1]} : vector<1x512xf32> to vector<1x256xf32>
    %266 = vector.extract_strided_slice %29 {offsets = [0, 159], sizes = [1, 256], strides = [1, 1]} : vector<1x512xf32> to vector<1x256xf32>
    %c37 = arith.constant 37 : index
    %267 = memref.load %arg5[%c37] : memref<98xf32, #tpu.memory_space<smem>>
    %c86 = arith.constant 86 : index
    %268 = memref.load %arg5[%c86] : memref<98xf32, #tpu.memory_space<smem>>
    %269 = vector.broadcast %267 : f32 to vector<1x256xf32>
    %270 = arith.mulf %269, %204 : vector<1x256xf32>
    %271 = arith.mulf %270, %265 : vector<1x256xf32>
    %272 = arith.addf %248, %271 : vector<1x256xf32>
    %273 = vector.broadcast %268 : f32 to vector<1x256xf32>
    %274 = arith.mulf %273, %204 : vector<1x256xf32>
    %275 = arith.mulf %274, %266 : vector<1x256xf32>
    %276 = arith.addf %252, %275 : vector<1x256xf32>
    %277 = vector.extract_strided_slice %28 {offsets = [0, 175], sizes = [1, 256], strides = [1, 1]} : vector<1x512xf32> to vector<1x256xf32>
    %278 = vector.extract_strided_slice %29 {offsets = [0, 175], sizes = [1, 256], strides = [1, 1]} : vector<1x512xf32> to vector<1x256xf32>
    %c44 = arith.constant 44 : index
    %279 = memref.load %arg5[%c44] : memref<98xf32, #tpu.memory_space<smem>>
    %c93 = arith.constant 93 : index
    %280 = memref.load %arg5[%c93] : memref<98xf32, #tpu.memory_space<smem>>
    %281 = vector.broadcast %279 : f32 to vector<1x256xf32>
    %282 = arith.mulf %281, %204 : vector<1x256xf32>
    %283 = arith.mulf %282, %277 : vector<1x256xf32>
    %284 = arith.addf %260, %283 : vector<1x256xf32>
    %285 = vector.broadcast %280 : f32 to vector<1x256xf32>
    %286 = arith.mulf %285, %204 : vector<1x256xf32>
    %287 = arith.mulf %286, %278 : vector<1x256xf32>
    %288 = arith.addf %264, %287 : vector<1x256xf32>
    %c3 = arith.constant 3 : index
    %c0_30 = arith.constant 0 : index
    %289 = vector.load %arg4[%c3, %c0_30] : memref<7x256xf32, #tpu.memory_space<vmem>>, vector<1x256xf32>
    %290 = vector.extract_strided_slice %28 {offsets = [0, 80], sizes = [1, 256], strides = [1, 1]} : vector<1x512xf32> to vector<1x256xf32>
    %291 = vector.extract_strided_slice %29 {offsets = [0, 80], sizes = [1, 256], strides = [1, 1]} : vector<1x512xf32> to vector<1x256xf32>
    %c3_31 = arith.constant 3 : index
    %292 = memref.load %arg5[%c3_31] : memref<98xf32, #tpu.memory_space<smem>>
    %c52 = arith.constant 52 : index
    %293 = memref.load %arg5[%c52] : memref<98xf32, #tpu.memory_space<smem>>
    %294 = vector.broadcast %292 : f32 to vector<1x256xf32>
    %295 = arith.mulf %294, %289 : vector<1x256xf32>
    %296 = arith.mulf %295, %290 : vector<1x256xf32>
    %297 = arith.addf %284, %296 : vector<1x256xf32>
    %298 = vector.broadcast %293 : f32 to vector<1x256xf32>
    %299 = arith.mulf %298, %289 : vector<1x256xf32>
    %300 = arith.mulf %299, %291 : vector<1x256xf32>
    %301 = arith.addf %288, %300 : vector<1x256xf32>
    %302 = vector.extract_strided_slice %28 {offsets = [0, 96], sizes = [1, 256], strides = [1, 1]} : vector<1x512xf32> to vector<1x256xf32>
    %303 = vector.extract_strided_slice %29 {offsets = [0, 96], sizes = [1, 256], strides = [1, 1]} : vector<1x512xf32> to vector<1x256xf32>
    %c10 = arith.constant 10 : index
    %304 = memref.load %arg5[%c10] : memref<98xf32, #tpu.memory_space<smem>>
    %c59 = arith.constant 59 : index
    %305 = memref.load %arg5[%c59] : memref<98xf32, #tpu.memory_space<smem>>
    %306 = vector.broadcast %304 : f32 to vector<1x256xf32>
    %307 = arith.mulf %306, %289 : vector<1x256xf32>
    %308 = arith.mulf %307, %302 : vector<1x256xf32>
    %309 = arith.addf %272, %308 : vector<1x256xf32>
    %310 = vector.broadcast %305 : f32 to vector<1x256xf32>
    %311 = arith.mulf %310, %289 : vector<1x256xf32>
    %312 = arith.mulf %311, %303 : vector<1x256xf32>
    %313 = arith.addf %276, %312 : vector<1x256xf32>
    %314 = vector.extract_strided_slice %28 {offsets = [0, 112], sizes = [1, 256], strides = [1, 1]} : vector<1x512xf32> to vector<1x256xf32>
    %315 = vector.extract_strided_slice %29 {offsets = [0, 112], sizes = [1, 256], strides = [1, 1]} : vector<1x512xf32> to vector<1x256xf32>
    %c17 = arith.constant 17 : index
    %316 = memref.load %arg5[%c17] : memref<98xf32, #tpu.memory_space<smem>>
    %c66 = arith.constant 66 : index
    %317 = memref.load %arg5[%c66] : memref<98xf32, #tpu.memory_space<smem>>
    %318 = vector.broadcast %316 : f32 to vector<1x256xf32>
    %319 = arith.mulf %318, %289 : vector<1x256xf32>
    %320 = arith.mulf %319, %314 : vector<1x256xf32>
    %321 = arith.addf %297, %320 : vector<1x256xf32>
    %322 = vector.broadcast %317 : f32 to vector<1x256xf32>
    %323 = arith.mulf %322, %289 : vector<1x256xf32>
    %324 = arith.mulf %323, %315 : vector<1x256xf32>
    %325 = arith.addf %301, %324 : vector<1x256xf32>
    %326 = vector.extract_strided_slice %28 {offsets = [0, 128], sizes = [1, 256], strides = [1, 1]} : vector<1x512xf32> to vector<1x256xf32>
    %327 = vector.extract_strided_slice %29 {offsets = [0, 128], sizes = [1, 256], strides = [1, 1]} : vector<1x512xf32> to vector<1x256xf32>
    %c24 = arith.constant 24 : index
    %328 = memref.load %arg5[%c24] : memref<98xf32, #tpu.memory_space<smem>>
    %c73 = arith.constant 73 : index
    %329 = memref.load %arg5[%c73] : memref<98xf32, #tpu.memory_space<smem>>
    %330 = vector.broadcast %328 : f32 to vector<1x256xf32>
    %331 = arith.mulf %330, %289 : vector<1x256xf32>
    %332 = arith.mulf %331, %326 : vector<1x256xf32>
    %333 = arith.addf %309, %332 : vector<1x256xf32>
    %334 = vector.broadcast %329 : f32 to vector<1x256xf32>
    %335 = arith.mulf %334, %289 : vector<1x256xf32>
    %336 = arith.mulf %335, %327 : vector<1x256xf32>
    %337 = arith.addf %313, %336 : vector<1x256xf32>
    %338 = vector.extract_strided_slice %28 {offsets = [0, 144], sizes = [1, 256], strides = [1, 1]} : vector<1x512xf32> to vector<1x256xf32>
    %339 = vector.extract_strided_slice %29 {offsets = [0, 144], sizes = [1, 256], strides = [1, 1]} : vector<1x512xf32> to vector<1x256xf32>
    %c31 = arith.constant 31 : index
    %340 = memref.load %arg5[%c31] : memref<98xf32, #tpu.memory_space<smem>>
    %c80 = arith.constant 80 : index
    %341 = memref.load %arg5[%c80] : memref<98xf32, #tpu.memory_space<smem>>
    %342 = vector.broadcast %340 : f32 to vector<1x256xf32>
    %343 = arith.mulf %342, %289 : vector<1x256xf32>
    %344 = arith.mulf %343, %338 : vector<1x256xf32>
    %345 = arith.addf %321, %344 : vector<1x256xf32>
    %346 = vector.broadcast %341 : f32 to vector<1x256xf32>
    %347 = arith.mulf %346, %289 : vector<1x256xf32>
    %348 = arith.mulf %347, %339 : vector<1x256xf32>
    %349 = arith.addf %325, %348 : vector<1x256xf32>
    %350 = vector.extract_strided_slice %28 {offsets = [0, 160], sizes = [1, 256], strides = [1, 1]} : vector<1x512xf32> to vector<1x256xf32>
    %351 = vector.extract_strided_slice %29 {offsets = [0, 160], sizes = [1, 256], strides = [1, 1]} : vector<1x512xf32> to vector<1x256xf32>
    %c38 = arith.constant 38 : index
    %352 = memref.load %arg5[%c38] : memref<98xf32, #tpu.memory_space<smem>>
    %c87 = arith.constant 87 : index
    %353 = memref.load %arg5[%c87] : memref<98xf32, #tpu.memory_space<smem>>
    %354 = vector.broadcast %352 : f32 to vector<1x256xf32>
    %355 = arith.mulf %354, %289 : vector<1x256xf32>
    %356 = arith.mulf %355, %350 : vector<1x256xf32>
    %357 = arith.addf %333, %356 : vector<1x256xf32>
    %358 = vector.broadcast %353 : f32 to vector<1x256xf32>
    %359 = arith.mulf %358, %289 : vector<1x256xf32>
    %360 = arith.mulf %359, %351 : vector<1x256xf32>
    %361 = arith.addf %337, %360 : vector<1x256xf32>
    %362 = vector.extract_strided_slice %28 {offsets = [0, 176], sizes = [1, 256], strides = [1, 1]} : vector<1x512xf32> to vector<1x256xf32>
    %363 = vector.extract_strided_slice %29 {offsets = [0, 176], sizes = [1, 256], strides = [1, 1]} : vector<1x512xf32> to vector<1x256xf32>
    %c45 = arith.constant 45 : index
    %364 = memref.load %arg5[%c45] : memref<98xf32, #tpu.memory_space<smem>>
    %c94 = arith.constant 94 : index
    %365 = memref.load %arg5[%c94] : memref<98xf32, #tpu.memory_space<smem>>
    %366 = vector.broadcast %364 : f32 to vector<1x256xf32>
    %367 = arith.mulf %366, %289 : vector<1x256xf32>
    %368 = arith.mulf %367, %362 : vector<1x256xf32>
    %369 = arith.addf %345, %368 : vector<1x256xf32>
    %370 = vector.broadcast %365 : f32 to vector<1x256xf32>
    %371 = arith.mulf %370, %289 : vector<1x256xf32>
    %372 = arith.mulf %371, %363 : vector<1x256xf32>
    %373 = arith.addf %349, %372 : vector<1x256xf32>
    %c4 = arith.constant 4 : index
    %c0_32 = arith.constant 0 : index
    %374 = vector.load %arg4[%c4, %c0_32] : memref<7x256xf32, #tpu.memory_space<vmem>>, vector<1x256xf32>
    %375 = vector.extract_strided_slice %28 {offsets = [0, 81], sizes = [1, 256], strides = [1, 1]} : vector<1x512xf32> to vector<1x256xf32>
    %376 = vector.extract_strided_slice %29 {offsets = [0, 81], sizes = [1, 256], strides = [1, 1]} : vector<1x512xf32> to vector<1x256xf32>
    %c4_33 = arith.constant 4 : index
    %377 = memref.load %arg5[%c4_33] : memref<98xf32, #tpu.memory_space<smem>>
    %c53 = arith.constant 53 : index
    %378 = memref.load %arg5[%c53] : memref<98xf32, #tpu.memory_space<smem>>
    %379 = vector.broadcast %377 : f32 to vector<1x256xf32>
    %380 = arith.mulf %379, %374 : vector<1x256xf32>
    %381 = arith.mulf %380, %375 : vector<1x256xf32>
    %382 = arith.addf %369, %381 : vector<1x256xf32>
    %383 = vector.broadcast %378 : f32 to vector<1x256xf32>
    %384 = arith.mulf %383, %374 : vector<1x256xf32>
    %385 = arith.mulf %384, %376 : vector<1x256xf32>
    %386 = arith.addf %373, %385 : vector<1x256xf32>
    %387 = vector.extract_strided_slice %28 {offsets = [0, 97], sizes = [1, 256], strides = [1, 1]} : vector<1x512xf32> to vector<1x256xf32>
    %388 = vector.extract_strided_slice %29 {offsets = [0, 97], sizes = [1, 256], strides = [1, 1]} : vector<1x512xf32> to vector<1x256xf32>
    %c11 = arith.constant 11 : index
    %389 = memref.load %arg5[%c11] : memref<98xf32, #tpu.memory_space<smem>>
    %c60 = arith.constant 60 : index
    %390 = memref.load %arg5[%c60] : memref<98xf32, #tpu.memory_space<smem>>
    %391 = vector.broadcast %389 : f32 to vector<1x256xf32>
    %392 = arith.mulf %391, %374 : vector<1x256xf32>
    %393 = arith.mulf %392, %387 : vector<1x256xf32>
    %394 = arith.addf %357, %393 : vector<1x256xf32>
    %395 = vector.broadcast %390 : f32 to vector<1x256xf32>
    %396 = arith.mulf %395, %374 : vector<1x256xf32>
    %397 = arith.mulf %396, %388 : vector<1x256xf32>
    %398 = arith.addf %361, %397 : vector<1x256xf32>
    %399 = vector.extract_strided_slice %28 {offsets = [0, 113], sizes = [1, 256], strides = [1, 1]} : vector<1x512xf32> to vector<1x256xf32>
    %400 = vector.extract_strided_slice %29 {offsets = [0, 113], sizes = [1, 256], strides = [1, 1]} : vector<1x512xf32> to vector<1x256xf32>
    %c18 = arith.constant 18 : index
    %401 = memref.load %arg5[%c18] : memref<98xf32, #tpu.memory_space<smem>>
    %c67 = arith.constant 67 : index
    %402 = memref.load %arg5[%c67] : memref<98xf32, #tpu.memory_space<smem>>
    %403 = vector.broadcast %401 : f32 to vector<1x256xf32>
    %404 = arith.mulf %403, %374 : vector<1x256xf32>
    %405 = arith.mulf %404, %399 : vector<1x256xf32>
    %406 = arith.addf %382, %405 : vector<1x256xf32>
    %407 = vector.broadcast %402 : f32 to vector<1x256xf32>
    %408 = arith.mulf %407, %374 : vector<1x256xf32>
    %409 = arith.mulf %408, %400 : vector<1x256xf32>
    %410 = arith.addf %386, %409 : vector<1x256xf32>
    %411 = vector.extract_strided_slice %28 {offsets = [0, 129], sizes = [1, 256], strides = [1, 1]} : vector<1x512xf32> to vector<1x256xf32>
    %412 = vector.extract_strided_slice %29 {offsets = [0, 129], sizes = [1, 256], strides = [1, 1]} : vector<1x512xf32> to vector<1x256xf32>
    %c25 = arith.constant 25 : index
    %413 = memref.load %arg5[%c25] : memref<98xf32, #tpu.memory_space<smem>>
    %c74 = arith.constant 74 : index
    %414 = memref.load %arg5[%c74] : memref<98xf32, #tpu.memory_space<smem>>
    %415 = vector.broadcast %413 : f32 to vector<1x256xf32>
    %416 = arith.mulf %415, %374 : vector<1x256xf32>
    %417 = arith.mulf %416, %411 : vector<1x256xf32>
    %418 = arith.addf %394, %417 : vector<1x256xf32>
    %419 = vector.broadcast %414 : f32 to vector<1x256xf32>
    %420 = arith.mulf %419, %374 : vector<1x256xf32>
    %421 = arith.mulf %420, %412 : vector<1x256xf32>
    %422 = arith.addf %398, %421 : vector<1x256xf32>
    %423 = vector.extract_strided_slice %28 {offsets = [0, 145], sizes = [1, 256], strides = [1, 1]} : vector<1x512xf32> to vector<1x256xf32>
    %424 = vector.extract_strided_slice %29 {offsets = [0, 145], sizes = [1, 256], strides = [1, 1]} : vector<1x512xf32> to vector<1x256xf32>
    %c32 = arith.constant 32 : index
    %425 = memref.load %arg5[%c32] : memref<98xf32, #tpu.memory_space<smem>>
    %c81 = arith.constant 81 : index
    %426 = memref.load %arg5[%c81] : memref<98xf32, #tpu.memory_space<smem>>
    %427 = vector.broadcast %425 : f32 to vector<1x256xf32>
    %428 = arith.mulf %427, %374 : vector<1x256xf32>
    %429 = arith.mulf %428, %423 : vector<1x256xf32>
    %430 = arith.addf %406, %429 : vector<1x256xf32>
    %431 = vector.broadcast %426 : f32 to vector<1x256xf32>
    %432 = arith.mulf %431, %374 : vector<1x256xf32>
    %433 = arith.mulf %432, %424 : vector<1x256xf32>
    %434 = arith.addf %410, %433 : vector<1x256xf32>
    %435 = vector.extract_strided_slice %28 {offsets = [0, 161], sizes = [1, 256], strides = [1, 1]} : vector<1x512xf32> to vector<1x256xf32>
    %436 = vector.extract_strided_slice %29 {offsets = [0, 161], sizes = [1, 256], strides = [1, 1]} : vector<1x512xf32> to vector<1x256xf32>
    %c39 = arith.constant 39 : index
    %437 = memref.load %arg5[%c39] : memref<98xf32, #tpu.memory_space<smem>>
    %c88 = arith.constant 88 : index
    %438 = memref.load %arg5[%c88] : memref<98xf32, #tpu.memory_space<smem>>
    %439 = vector.broadcast %437 : f32 to vector<1x256xf32>
    %440 = arith.mulf %439, %374 : vector<1x256xf32>
    %441 = arith.mulf %440, %435 : vector<1x256xf32>
    %442 = arith.addf %418, %441 : vector<1x256xf32>
    %443 = vector.broadcast %438 : f32 to vector<1x256xf32>
    %444 = arith.mulf %443, %374 : vector<1x256xf32>
    %445 = arith.mulf %444, %436 : vector<1x256xf32>
    %446 = arith.addf %422, %445 : vector<1x256xf32>
    %447 = vector.extract_strided_slice %28 {offsets = [0, 177], sizes = [1, 256], strides = [1, 1]} : vector<1x512xf32> to vector<1x256xf32>
    %448 = vector.extract_strided_slice %29 {offsets = [0, 177], sizes = [1, 256], strides = [1, 1]} : vector<1x512xf32> to vector<1x256xf32>
    %c46 = arith.constant 46 : index
    %449 = memref.load %arg5[%c46] : memref<98xf32, #tpu.memory_space<smem>>
    %c95 = arith.constant 95 : index
    %450 = memref.load %arg5[%c95] : memref<98xf32, #tpu.memory_space<smem>>
    %451 = vector.broadcast %449 : f32 to vector<1x256xf32>
    %452 = arith.mulf %451, %374 : vector<1x256xf32>
    %453 = arith.mulf %452, %447 : vector<1x256xf32>
    %454 = arith.addf %430, %453 : vector<1x256xf32>
    %455 = vector.broadcast %450 : f32 to vector<1x256xf32>
    %456 = arith.mulf %455, %374 : vector<1x256xf32>
    %457 = arith.mulf %456, %448 : vector<1x256xf32>
    %458 = arith.addf %434, %457 : vector<1x256xf32>
    %c5 = arith.constant 5 : index
    %c0_34 = arith.constant 0 : index
    %459 = vector.load %arg4[%c5, %c0_34] : memref<7x256xf32, #tpu.memory_space<vmem>>, vector<1x256xf32>
    %460 = vector.extract_strided_slice %28 {offsets = [0, 82], sizes = [1, 256], strides = [1, 1]} : vector<1x512xf32> to vector<1x256xf32>
    %461 = vector.extract_strided_slice %29 {offsets = [0, 82], sizes = [1, 256], strides = [1, 1]} : vector<1x512xf32> to vector<1x256xf32>
    %c5_35 = arith.constant 5 : index
    %462 = memref.load %arg5[%c5_35] : memref<98xf32, #tpu.memory_space<smem>>
    %c54 = arith.constant 54 : index
    %463 = memref.load %arg5[%c54] : memref<98xf32, #tpu.memory_space<smem>>
    %464 = vector.broadcast %462 : f32 to vector<1x256xf32>
    %465 = arith.mulf %464, %459 : vector<1x256xf32>
    %466 = arith.mulf %465, %460 : vector<1x256xf32>
    %467 = arith.addf %454, %466 : vector<1x256xf32>
    %468 = vector.broadcast %463 : f32 to vector<1x256xf32>
    %469 = arith.mulf %468, %459 : vector<1x256xf32>
    %470 = arith.mulf %469, %461 : vector<1x256xf32>
    %471 = arith.addf %458, %470 : vector<1x256xf32>
    %472 = vector.extract_strided_slice %28 {offsets = [0, 98], sizes = [1, 256], strides = [1, 1]} : vector<1x512xf32> to vector<1x256xf32>
    %473 = vector.extract_strided_slice %29 {offsets = [0, 98], sizes = [1, 256], strides = [1, 1]} : vector<1x512xf32> to vector<1x256xf32>
    %c12 = arith.constant 12 : index
    %474 = memref.load %arg5[%c12] : memref<98xf32, #tpu.memory_space<smem>>
    %c61 = arith.constant 61 : index
    %475 = memref.load %arg5[%c61] : memref<98xf32, #tpu.memory_space<smem>>
    %476 = vector.broadcast %474 : f32 to vector<1x256xf32>
    %477 = arith.mulf %476, %459 : vector<1x256xf32>
    %478 = arith.mulf %477, %472 : vector<1x256xf32>
    %479 = arith.addf %442, %478 : vector<1x256xf32>
    %480 = vector.broadcast %475 : f32 to vector<1x256xf32>
    %481 = arith.mulf %480, %459 : vector<1x256xf32>
    %482 = arith.mulf %481, %473 : vector<1x256xf32>
    %483 = arith.addf %446, %482 : vector<1x256xf32>
    %484 = vector.extract_strided_slice %28 {offsets = [0, 114], sizes = [1, 256], strides = [1, 1]} : vector<1x512xf32> to vector<1x256xf32>
    %485 = vector.extract_strided_slice %29 {offsets = [0, 114], sizes = [1, 256], strides = [1, 1]} : vector<1x512xf32> to vector<1x256xf32>
    %c19 = arith.constant 19 : index
    %486 = memref.load %arg5[%c19] : memref<98xf32, #tpu.memory_space<smem>>
    %c68 = arith.constant 68 : index
    %487 = memref.load %arg5[%c68] : memref<98xf32, #tpu.memory_space<smem>>
    %488 = vector.broadcast %486 : f32 to vector<1x256xf32>
    %489 = arith.mulf %488, %459 : vector<1x256xf32>
    %490 = arith.mulf %489, %484 : vector<1x256xf32>
    %491 = arith.addf %467, %490 : vector<1x256xf32>
    %492 = vector.broadcast %487 : f32 to vector<1x256xf32>
    %493 = arith.mulf %492, %459 : vector<1x256xf32>
    %494 = arith.mulf %493, %485 : vector<1x256xf32>
    %495 = arith.addf %471, %494 : vector<1x256xf32>
    %496 = vector.extract_strided_slice %28 {offsets = [0, 130], sizes = [1, 256], strides = [1, 1]} : vector<1x512xf32> to vector<1x256xf32>
    %497 = vector.extract_strided_slice %29 {offsets = [0, 130], sizes = [1, 256], strides = [1, 1]} : vector<1x512xf32> to vector<1x256xf32>
    %c26 = arith.constant 26 : index
    %498 = memref.load %arg5[%c26] : memref<98xf32, #tpu.memory_space<smem>>
    %c75 = arith.constant 75 : index
    %499 = memref.load %arg5[%c75] : memref<98xf32, #tpu.memory_space<smem>>
    %500 = vector.broadcast %498 : f32 to vector<1x256xf32>
    %501 = arith.mulf %500, %459 : vector<1x256xf32>
    %502 = arith.mulf %501, %496 : vector<1x256xf32>
    %503 = arith.addf %479, %502 : vector<1x256xf32>
    %504 = vector.broadcast %499 : f32 to vector<1x256xf32>
    %505 = arith.mulf %504, %459 : vector<1x256xf32>
    %506 = arith.mulf %505, %497 : vector<1x256xf32>
    %507 = arith.addf %483, %506 : vector<1x256xf32>
    %508 = vector.extract_strided_slice %28 {offsets = [0, 146], sizes = [1, 256], strides = [1, 1]} : vector<1x512xf32> to vector<1x256xf32>
    %509 = vector.extract_strided_slice %29 {offsets = [0, 146], sizes = [1, 256], strides = [1, 1]} : vector<1x512xf32> to vector<1x256xf32>
    %c33 = arith.constant 33 : index
    %510 = memref.load %arg5[%c33] : memref<98xf32, #tpu.memory_space<smem>>
    %c82 = arith.constant 82 : index
    %511 = memref.load %arg5[%c82] : memref<98xf32, #tpu.memory_space<smem>>
    %512 = vector.broadcast %510 : f32 to vector<1x256xf32>
    %513 = arith.mulf %512, %459 : vector<1x256xf32>
    %514 = arith.mulf %513, %508 : vector<1x256xf32>
    %515 = arith.addf %491, %514 : vector<1x256xf32>
    %516 = vector.broadcast %511 : f32 to vector<1x256xf32>
    %517 = arith.mulf %516, %459 : vector<1x256xf32>
    %518 = arith.mulf %517, %509 : vector<1x256xf32>
    %519 = arith.addf %495, %518 : vector<1x256xf32>
    %520 = vector.extract_strided_slice %28 {offsets = [0, 162], sizes = [1, 256], strides = [1, 1]} : vector<1x512xf32> to vector<1x256xf32>
    %521 = vector.extract_strided_slice %29 {offsets = [0, 162], sizes = [1, 256], strides = [1, 1]} : vector<1x512xf32> to vector<1x256xf32>
    %c40 = arith.constant 40 : index
    %522 = memref.load %arg5[%c40] : memref<98xf32, #tpu.memory_space<smem>>
    %c89 = arith.constant 89 : index
    %523 = memref.load %arg5[%c89] : memref<98xf32, #tpu.memory_space<smem>>
    %524 = vector.broadcast %522 : f32 to vector<1x256xf32>
    %525 = arith.mulf %524, %459 : vector<1x256xf32>
    %526 = arith.mulf %525, %520 : vector<1x256xf32>
    %527 = arith.addf %503, %526 : vector<1x256xf32>
    %528 = vector.broadcast %523 : f32 to vector<1x256xf32>
    %529 = arith.mulf %528, %459 : vector<1x256xf32>
    %530 = arith.mulf %529, %521 : vector<1x256xf32>
    %531 = arith.addf %507, %530 : vector<1x256xf32>
    %532 = vector.extract_strided_slice %28 {offsets = [0, 178], sizes = [1, 256], strides = [1, 1]} : vector<1x512xf32> to vector<1x256xf32>
    %533 = vector.extract_strided_slice %29 {offsets = [0, 178], sizes = [1, 256], strides = [1, 1]} : vector<1x512xf32> to vector<1x256xf32>
    %c47 = arith.constant 47 : index
    %534 = memref.load %arg5[%c47] : memref<98xf32, #tpu.memory_space<smem>>
    %c96 = arith.constant 96 : index
    %535 = memref.load %arg5[%c96] : memref<98xf32, #tpu.memory_space<smem>>
    %536 = vector.broadcast %534 : f32 to vector<1x256xf32>
    %537 = arith.mulf %536, %459 : vector<1x256xf32>
    %538 = arith.mulf %537, %532 : vector<1x256xf32>
    %539 = arith.addf %515, %538 : vector<1x256xf32>
    %540 = vector.broadcast %535 : f32 to vector<1x256xf32>
    %541 = arith.mulf %540, %459 : vector<1x256xf32>
    %542 = arith.mulf %541, %533 : vector<1x256xf32>
    %543 = arith.addf %519, %542 : vector<1x256xf32>
    %c6 = arith.constant 6 : index
    %c0_36 = arith.constant 0 : index
    %544 = vector.load %arg4[%c6, %c0_36] : memref<7x256xf32, #tpu.memory_space<vmem>>, vector<1x256xf32>
    %545 = vector.extract_strided_slice %28 {offsets = [0, 83], sizes = [1, 256], strides = [1, 1]} : vector<1x512xf32> to vector<1x256xf32>
    %546 = vector.extract_strided_slice %29 {offsets = [0, 83], sizes = [1, 256], strides = [1, 1]} : vector<1x512xf32> to vector<1x256xf32>
    %c6_37 = arith.constant 6 : index
    %547 = memref.load %arg5[%c6_37] : memref<98xf32, #tpu.memory_space<smem>>
    %c55 = arith.constant 55 : index
    %548 = memref.load %arg5[%c55] : memref<98xf32, #tpu.memory_space<smem>>
    %549 = vector.broadcast %547 : f32 to vector<1x256xf32>
    %550 = arith.mulf %549, %544 : vector<1x256xf32>
    %551 = arith.mulf %550, %545 : vector<1x256xf32>
    %552 = arith.addf %539, %551 : vector<1x256xf32>
    %553 = vector.broadcast %548 : f32 to vector<1x256xf32>
    %554 = arith.mulf %553, %544 : vector<1x256xf32>
    %555 = arith.mulf %554, %546 : vector<1x256xf32>
    %556 = arith.addf %543, %555 : vector<1x256xf32>
    %557 = vector.extract_strided_slice %28 {offsets = [0, 99], sizes = [1, 256], strides = [1, 1]} : vector<1x512xf32> to vector<1x256xf32>
    %558 = vector.extract_strided_slice %29 {offsets = [0, 99], sizes = [1, 256], strides = [1, 1]} : vector<1x512xf32> to vector<1x256xf32>
    %c13 = arith.constant 13 : index
    %559 = memref.load %arg5[%c13] : memref<98xf32, #tpu.memory_space<smem>>
    %c62 = arith.constant 62 : index
    %560 = memref.load %arg5[%c62] : memref<98xf32, #tpu.memory_space<smem>>
    %561 = vector.broadcast %559 : f32 to vector<1x256xf32>
    %562 = arith.mulf %561, %544 : vector<1x256xf32>
    %563 = arith.mulf %562, %557 : vector<1x256xf32>
    %564 = arith.addf %527, %563 : vector<1x256xf32>
    %565 = vector.broadcast %560 : f32 to vector<1x256xf32>
    %566 = arith.mulf %565, %544 : vector<1x256xf32>
    %567 = arith.mulf %566, %558 : vector<1x256xf32>
    %568 = arith.addf %531, %567 : vector<1x256xf32>
    %569 = vector.extract_strided_slice %28 {offsets = [0, 115], sizes = [1, 256], strides = [1, 1]} : vector<1x512xf32> to vector<1x256xf32>
    %570 = vector.extract_strided_slice %29 {offsets = [0, 115], sizes = [1, 256], strides = [1, 1]} : vector<1x512xf32> to vector<1x256xf32>
    %c20 = arith.constant 20 : index
    %571 = memref.load %arg5[%c20] : memref<98xf32, #tpu.memory_space<smem>>
    %c69 = arith.constant 69 : index
    %572 = memref.load %arg5[%c69] : memref<98xf32, #tpu.memory_space<smem>>
    %573 = vector.broadcast %571 : f32 to vector<1x256xf32>
    %574 = arith.mulf %573, %544 : vector<1x256xf32>
    %575 = arith.mulf %574, %569 : vector<1x256xf32>
    %576 = arith.addf %552, %575 : vector<1x256xf32>
    %577 = vector.broadcast %572 : f32 to vector<1x256xf32>
    %578 = arith.mulf %577, %544 : vector<1x256xf32>
    %579 = arith.mulf %578, %570 : vector<1x256xf32>
    %580 = arith.addf %556, %579 : vector<1x256xf32>
    %581 = vector.extract_strided_slice %28 {offsets = [0, 131], sizes = [1, 256], strides = [1, 1]} : vector<1x512xf32> to vector<1x256xf32>
    %582 = vector.extract_strided_slice %29 {offsets = [0, 131], sizes = [1, 256], strides = [1, 1]} : vector<1x512xf32> to vector<1x256xf32>
    %c27 = arith.constant 27 : index
    %583 = memref.load %arg5[%c27] : memref<98xf32, #tpu.memory_space<smem>>
    %c76 = arith.constant 76 : index
    %584 = memref.load %arg5[%c76] : memref<98xf32, #tpu.memory_space<smem>>
    %585 = vector.broadcast %583 : f32 to vector<1x256xf32>
    %586 = arith.mulf %585, %544 : vector<1x256xf32>
    %587 = arith.mulf %586, %581 : vector<1x256xf32>
    %588 = arith.addf %564, %587 : vector<1x256xf32>
    %589 = vector.broadcast %584 : f32 to vector<1x256xf32>
    %590 = arith.mulf %589, %544 : vector<1x256xf32>
    %591 = arith.mulf %590, %582 : vector<1x256xf32>
    %592 = arith.addf %568, %591 : vector<1x256xf32>
    %593 = vector.extract_strided_slice %28 {offsets = [0, 147], sizes = [1, 256], strides = [1, 1]} : vector<1x512xf32> to vector<1x256xf32>
    %594 = vector.extract_strided_slice %29 {offsets = [0, 147], sizes = [1, 256], strides = [1, 1]} : vector<1x512xf32> to vector<1x256xf32>
    %c34 = arith.constant 34 : index
    %595 = memref.load %arg5[%c34] : memref<98xf32, #tpu.memory_space<smem>>
    %c83 = arith.constant 83 : index
    %596 = memref.load %arg5[%c83] : memref<98xf32, #tpu.memory_space<smem>>
    %597 = vector.broadcast %595 : f32 to vector<1x256xf32>
    %598 = arith.mulf %597, %544 : vector<1x256xf32>
    %599 = arith.mulf %598, %593 : vector<1x256xf32>
    %600 = arith.addf %576, %599 : vector<1x256xf32>
    %601 = vector.broadcast %596 : f32 to vector<1x256xf32>
    %602 = arith.mulf %601, %544 : vector<1x256xf32>
    %603 = arith.mulf %602, %594 : vector<1x256xf32>
    %604 = arith.addf %580, %603 : vector<1x256xf32>
    %605 = vector.extract_strided_slice %28 {offsets = [0, 163], sizes = [1, 256], strides = [1, 1]} : vector<1x512xf32> to vector<1x256xf32>
    %606 = vector.extract_strided_slice %29 {offsets = [0, 163], sizes = [1, 256], strides = [1, 1]} : vector<1x512xf32> to vector<1x256xf32>
    %c41 = arith.constant 41 : index
    %607 = memref.load %arg5[%c41] : memref<98xf32, #tpu.memory_space<smem>>
    %c90 = arith.constant 90 : index
    %608 = memref.load %arg5[%c90] : memref<98xf32, #tpu.memory_space<smem>>
    %609 = vector.broadcast %607 : f32 to vector<1x256xf32>
    %610 = arith.mulf %609, %544 : vector<1x256xf32>
    %611 = arith.mulf %610, %605 : vector<1x256xf32>
    %612 = arith.addf %588, %611 : vector<1x256xf32>
    %613 = vector.broadcast %608 : f32 to vector<1x256xf32>
    %614 = arith.mulf %613, %544 : vector<1x256xf32>
    %615 = arith.mulf %614, %606 : vector<1x256xf32>
    %616 = arith.addf %592, %615 : vector<1x256xf32>
    %617 = vector.extract_strided_slice %28 {offsets = [0, 179], sizes = [1, 256], strides = [1, 1]} : vector<1x512xf32> to vector<1x256xf32>
    %618 = vector.extract_strided_slice %29 {offsets = [0, 179], sizes = [1, 256], strides = [1, 1]} : vector<1x512xf32> to vector<1x256xf32>
    %c48 = arith.constant 48 : index
    %619 = memref.load %arg5[%c48] : memref<98xf32, #tpu.memory_space<smem>>
    %c97 = arith.constant 97 : index
    %620 = memref.load %arg5[%c97] : memref<98xf32, #tpu.memory_space<smem>>
    %621 = vector.broadcast %619 : f32 to vector<1x256xf32>
    %622 = arith.mulf %621, %544 : vector<1x256xf32>
    %623 = arith.mulf %622, %617 : vector<1x256xf32>
    %624 = arith.addf %600, %623 : vector<1x256xf32>
    %625 = vector.broadcast %620 : f32 to vector<1x256xf32>
    %626 = arith.mulf %625, %544 : vector<1x256xf32>
    %627 = arith.mulf %626, %618 : vector<1x256xf32>
    %628 = arith.addf %604, %627 : vector<1x256xf32>
    %629 = arith.addf %624, %612 : vector<1x256xf32>
    %630 = arith.addf %628, %616 : vector<1x256xf32>
    %631 = arith.addf %629, %630 : vector<1x256xf32>
    %c0_38 = arith.constant 0 : index
    %632 = memref.load %arg6[%c0_38] : memref<1xf32, #tpu.memory_space<smem>>
    %633 = vector.broadcast %632 : f32 to vector<1x256xf32>
    %634 = arith.addf %631, %633 : vector<1x256xf32>
    %635 = arith.negf %634 : vector<1x256xf32>
    %636 = math.exp %635 : vector<1x256xf32>
    %cst_39 = arith.constant 1.000000e+00 : f32
    %637 = vector.broadcast %cst_39 : f32 to vector<1x256xf32>
    %638 = arith.addf %637, %636 : vector<1x256xf32>
    %639 = arith.divf %637, %638 : vector<1x256xf32>
    %c0_40 = arith.constant 0 : index
    %c0_41 = arith.constant 0 : index
    %c0_42 = arith.constant 0 : index
    %640 = vector.load %arg8[%c0_40, %c0_41, %c0_42] : memref<1x1x256xf32, #tpu.memory_space<vmem>>, vector<1x1x256xf32>
    %641 = vector.shape_cast %640 : vector<1x1x256xf32> to vector<1x256xf32>
    %642 = vector.shape_cast %639 : vector<1x256xf32> to vector<1x1x256xf32>
    tpu.vector_store %arg8[%c0_40, %c0_41, %c0_42], %642 {strides = array<i32>} : memref<1x1x256xf32, #tpu.memory_space<vmem>>, vector<1x1x256xf32>,
    return
  }
  func.func @transform_0(%arg0: i32) -> (i32, i32, i32) {
    %c0_i32 = arith.constant 0 : i32
    %c0_i32_0 = arith.constant 0 : i32
    %c0_i32_1 = arith.constant 0 : i32
    return %arg0, %c0_i32, %c0_i32_0 : i32, i32, i32
  }
  func.func @transform_1(%arg0: i32) -> (i32, i32) {
    %c0_i32 = arith.constant 0 : i32
    %c0_i32_0 = arith.constant 0 : i32
    %c0_i32_1 = arith.constant 0 : i32
    return %c0_i32, %c0_i32_0 : i32, i32
  }
  func.func @transform_2(%arg0: i32) -> (i32, i32) {
    %c0_i32 = arith.constant 0 : i32
    %c0_i32_0 = arith.constant 0 : i32
    %c0_i32_1 = arith.constant 0 : i32
    return %c0_i32, %c0_i32_0 : i32, i32
  }
  func.func @transform_3(%arg0: i32) -> (i32, i32) {
    %c0_i32 = arith.constant 0 : i32
    %c0_i32_0 = arith.constant 0 : i32
    %c0_i32_1 = arith.constant 0 : i32
    return %c0_i32, %c0_i32_0 : i32, i32
  }
  func.func @transform_4(%arg0: i32) -> i32 {
    %c0_i32 = arith.constant 0 : i32
    %c0_i32_0 = arith.constant 0 : i32
    return %c0_i32 : i32
  }
  func.func @transform_5(%arg0: i32) -> i32 {
    %c0_i32 = arith.constant 0 : i32
    %c0_i32_0 = arith.constant 0 : i32
    return %c0_i32 : i32
  }
  func.func @transform_6(%arg0: i32) -> (i32, i32, i32) {
    %c0_i32 = arith.constant 0 : i32
    %c0_i32_0 = arith.constant 0 : i32
    %c0_i32_1 = arith.constant 0 : i32
    return %arg0, %c0_i32, %c0_i32_0 : i32, i32, i32
  }
  func.func @transform_7(%arg0: i32) -> (i32, i32, i32) {
    %c0_i32 = arith.constant 0 : i32
    %c0_i32_0 = arith.constant 0 : i32
    %c0_i32_1 = arith.constant 0 : i32
    return %arg0, %c0_i32, %c0_i32_0 : i32, i32, i32
  }
}

</mosaic_0001>

<bundles_post_ra>
// kernel: _lambda_.1
= control target key start
LH: loop header
LB: loop body
LE: loop exit
PB: predicated region body
PF: predicated region fallthrough
CT: control target
= control target key end

     0   :  { %s3355_s0 = inlined_call_operand.vmem [shape: f32[2,32,256], index: 0, kind: input, shape index: {}]   ;;  %s3356_s1 = inlined_call_operand.vmem [shape: f32[32,2], index: 1, kind: input, shape index: {}]   ;;  %s3357_s2 = inlined_call_operand.vmem [shape: f32[2,32], index: 2, kind: input, shape index: {}]   ;;  %s3358_s3 = inlined_call_operand.vmem [shape: f32[7,256], index: 3, kind: input, shape index: {}]   ;;  %s3359_s4 = inlined_call_operand.vmem [shape: f32[98], index: 4, kind: input, shape index: {}]   ;;  %s3360_s5 = inlined_call_operand.<no memory space> [shape: f32[1], index: 5, kind: input, shape index: {}]   ;;  %s3361_s6 = inlined_call_operand.hbm [shape: f32[2,1,32], index: 6, kind: output, shape index: {0}]   ;;  %s3362_s7 = inlined_call_operand.vmem [shape: f32[2,1,256], index: 7, kind: output, shape index: {1}]  }
   0x1   :  { %3371 = sst [smem:[#allocation27_spill]] %s3355_s0 }
   0x2   :  { %3372 = sst [smem:[#allocation28_spill]] %s3356_s1 }
   0x3   :  { %3373 = sst [smem:[#allocation29_spill]] %s3357_s2 }
   0x4   :  { %3374 = sst [smem:[#allocation30_spill]] %s3359_s4 }
   0x5   :  { %3375 = sst [smem:[#allocation31_spill]] %s3361_s6 }
   0x6   :  { %13 = sst [smem:[#allocation2]] %s3360_s5 }
   0x7   :  { %14 = vsyncpa [#allocation5], 0 }
   0x8   :  { %15 = vsyncpa [#allocation4], 0 }
   0x9   :  { %17 = vsyncpa [#allocation4 + $0x1], 0  ;;  %s2297_s26 = smov 0   ;;  %s2299_s27 = smov 0  }
   0xa   :  { %s2301_s28 = smov 0   ;;  %s2303_s29 = smov 0  }
   0xb LB: > { %3376 = sst [smem:[#allocation9_spill]] %s2187_s26  ;;  %s2318_s5 = sadd.s32 4294967295, %s2199_s29   ;;  %s2199_s29 = sphi %s2303_s29, %s3418_s29   ;;  %s2195_s28 = sphi %s2301_s28, %s3420_s28   ;;  %s2191_s27 = sphi %s2299_s27, %s3422_s27   ;;  %s2187_s26 = sphi %s2297_s26, %s3421_s26  }
   0xc   : > { %3377 = sst [smem:[#allocation10_spill]] %s2195_s28  ;;  %s1867_s30 = sadd.s32 4294967294, %s2199_s29  }
   0xd   : > { %3378 = sst [smem:[#allocation11_spill]] %s2199_s29  ;;  %s2322_s8 = sadd.s32 1, %s2199_s29  }
   0xe   : > { %3379 = sst [smem:[#allocation12_spill]] %s2322_s8  ;;  %s161_s9 = sadd.s32 1, %s2195_s28 }
   0xf   : > { %s158_s10 = ssub.s32 %s2199_s29, %s2322_s8  ;;  %p171_p0 = scmp.ne.s32.totalorder %s2195_s28, %s2191_s27 }
  0x10   : > { %p159_p1 = scmp.eq.s32.totalorder %s158_s10, 0  ;;  %p172_p2 = scmp.eq.s32.totalorder %s2318_s5, 1 }
  0x11   : > { %p177_p3 = scmp.ne.s32.totalorder %s2191_s27, %s2187_s26  ;;  %p178_p4 = scmp.eq.s32.totalorder %s1867_s30, 1 }
  0x12   : > { %s2333_s11 = scalar_select %p159_p1, %s2195_s28, %s161_s9  }
  0x13   : > { %p2335_p5 = por %p172_p2, %p171_p0  ;;  %p2339_p6 = por %p178_p4, %p177_p3 }
  0x14   : > { %3380 = sst [smem:[#allocation13_spill]] %s2333_s11  ;;  %p1868_p7 = scmp.ge.s32.totalorder %s2199_s29, 1 }
  0x15   : > { %s3382_s13 = scalar_select %p2339_p6, 1, 0 }
  0x16   : > { %p211_p8 = scmp.lt.s32.totalorder %s2199_s29, 3  ;;  %p2025_p9 = scmp.eq.s32.totalorder %s2318_s5, 0 }
  0x17   : > { %3383 = sst [smem:[#allocation14_spill]] %s3382_s13 }
  0x18   : > { %p2346_p10 = pnand %p1868_p7, %p211_p8  ;;  %s3385_s4 = sld [smem:[#allocation30_spill]] }
  0x1a   : > { %p2017_p11 = pneg %p2346_p10 }
  0x1c   : > { %p2018_p12 = pnand %p2025_p9, %p2017_p11 }
  0x1e   : > { %s233_s17 = sshll.u32 %s3385_s4, 4  ;;  %p2122_p0 = pneg %p2018_p12  ;;  %s234_s17 = int_to_ptr.vmem [resolvable:$true] %s233_s17 }
  0x1f   : > { %s2120_s18 = scalar_lea.vmem %s234_s17, 16  ;;  %p2128_p3 = scmp.lt.s32.totalorder %s234_s17, %s234_s17 }
  0x20   : > { %p2121_p13 = scmp.ne.s32.totalorder %s234_s17, %s2120_s18  ;;  %p2129_p4 = scmp.lt.s32.totalorder %s2120_s18, %s2120_s18 }
  0x22   : > { %p2123_p1 = pnand %p2122_p0, %p2121_p13  ;;  %p2130_p7 = por %p2129_p4, %p2128_p3 }
  0x24   : > { %p2124_p2 = pneg %p2123_p1 }
  0x26   : > { %p2131_p8 = pnand %p2130_p7, %p2124_p2 }
  0x28   : > { %2134 = shalt.err (!%p2131_p8)
}
  0x29   : > { %s2201_s19 = smov [#allocation3]   ;;  %257 = sbr.rel (%p2346_p10) target bundleno = 652 (0x28c), region = 44 }
  0x2a   : > { %2020 = dma.vmem_to_smem (!%p2018_p12), %s234_s17, 16, %s2201_s19, [#allocation5]  }
  0x2e   : > { %2178 = dma.done.wait (%p2025_p9), [#allocation5], 16  }
  0x2f   : > { %2180 = vsyncadd (%p2025_p9), [#allocation5], 4294967280 }
  0x30   : > { %263 = sfence }
  0x31   : > { %p293_p11 = scmp.lt.s32.totalorder %s2318_s5, 1  ;;  %v2202_v0 = vmov 0.0   ;;  %s3386_s0 = sld [smem:[#allocation27_spill]]  ;;  %v3370_v27 = vlaneseq  ;;  %v2203_v29 = vmov 1966171168   ;;  %vm2204_vm0 = vmmov 0  }
  0x32   : > { %1995 = vmatprep.subr.mxu0 %v2202_v0  ;;  %2006 = vmatprep.subr.mxu1 %v2202_v0  ;;  %v614_v30 = vunpack.c.l.s4 %v2203_v29  ;;  %s3387_s1 = sld [smem:[#allocation28_spill]]  ;;  %s2205_s18 = smov 51   ;;  %vm358_vm1 = vcmask 130112   ;;  %vm365_vm2 = vcmask 195712   ;;  %vm372_vm3 = vcmask 261312  }
  0x33   : > { %s2367_s20 = scalar_select %p293_p11, %s2318_s5, 1  ;;  %v2374_v40 = vshrl.u32 %v3370_v27, 7  ;;  %2003 = vmatprep.mubr.msk.f32.mxu0 %vm2204_vm0, %v2202_v0  ;;  %2008 = vmatprep.mubr.msk.f32.mxu1 %vm2204_vm0, %v2202_v0  ;;  %vm399_vm4 = vcmask 1040384   ;;  %vm401_vm5 = vcmask 261120   ;;  %vm638_vm6 = vcmask 416768  }
  0x34   : > { %v615_v42 = vunpack.c.0.s8 %v614_v30  ;;  %s2206_s19 = smov 35   ;;  %s2208_s22 = smov 3   ;;  %vm684_vm7 = vcmask 285696   ;;  %vm705_vm8 = vcmask 154624   ;;  %vm726_vm9 = vcmask 23552  }
  0x35   : > { %s1987_s21 = sshll.u32 %s2367_s20, 6  ;;  %s2209_s23 = smov 115   ;;  %vm770_vm10 = vcmask 941056   ;;  %vm807_vm11 = vcmask 809984   ;;  %vm828_vm12 = vcmask 678912   ;;  %vm851_vm13 = vcmask 408576  }
  0x36   : > { %v2377_v52 = vsub.s32 %v615_v42, %v2374_v40  ;;  %s2211_s25 = smov 83   ;;  %s2212_s30 = smov 50   ;;  %vm872_vm14 = vcmask 277504   ;;  %vm893_vm15 = vcmask 146432   ;;  %vm476_vm0 = vcmask 15360  }
  0x37   : > { %s297_s24 = scalar_lea.vmem %s3386_s0, %s1987_s21  ;;  %s2207_s21 = smov 19  }
  0x38   : > { %v306_v1 = vld [vmem:[%s297_s24 + $0x20] sm:$0xff]  ;;  %v307_v2 = vld [vmem:[%s297_s24 + $0x28] sm:$0xff]  ;;  %v308_v7 = vld [vmem:[%s297_s24 + $0x30] sm:$0xff]  ;;  %s2213_s9 = smov 34   ;;  %s2214_s10 = smov 18  }
  0x39   : > { %v302_v3 = vld [vmem:[%s297_s24] sm:$0xff]  ;;  %v321_v4 = vadd.f32 %v307_v2, %v306_v1  ;;  %v303_v5 = vld [vmem:[%s297_s24 + $0x8] sm:$0xff]  ;;  %v309_v8 = vld [vmem:[%s297_s24 + $0x38] sm:$0xff]  ;;  %v337_v43 = vmax.f32 %v306_v1, %v307_v2  ;;  %s2215_s14 = smov 2   ;;  %s2216_s15 = smov 114  }
  0x3a   : > { %v586_v6 = vmax.f32 %v302_v3, %v306_v1  ;;  %v315_v9 = vadd.f32 %v303_v5, %v302_v3  ;;  %v595_v10 = vmax.f32 %v303_v5, %v307_v2  ;;  %v304_v11 = vld [vmem:[%s297_s24 + $0x10] sm:$0xff]  ;;  %v305_v12 = vld [vmem:[%s297_s24 + $0x18] sm:$0xff]  ;;  %v324_v13 = vadd.f32 %v309_v8, %v308_v7  ;;  %s2210_s24 = smov 99   ;;  %s2217_s16 = smov 98  }
  0x3b   : > { %322 = vadd.xlane.f32.xlu1 %v321_v4  ;;  %v566_v14 = vadd.f32 %v304_v11, %v302_v3  ;;  %v575_v15 = vadd.f32 %v305_v12, %v303_v5  ;;  %v587_v16 = vmax.f32 %v304_v11, %v308_v7  ;;  %v318_v17 = vadd.f32 %v305_v12, %v304_v11  ;;  %s2218_s17 = smov 82   ;;  %s3388_s2 = sld [smem:[#allocation29_spill]] }
  0x3c   : > { %316 = vadd.xlane.f32.xlu0 %v315_v9  ;;  %v596_v18 = vmax.f32 %v305_v12, %v309_v8  ;;  %v334_v26 = vmax.f32 %v304_v11, %v305_v12  ;;  %v331_v31 = vmax.f32 %v302_v3, %v303_v5  ;;  %v340_v39 = vmax.f32 %v308_v7, %v309_v8  ;;  %s2880_s0 = sld [smem:[#allocation3 + $0x36]] }
  0x3d   : > { %v567_v19 = vadd.f32 %v566_v14, %v306_v1  ;;  %v576_v20 = vadd.f32 %v575_v15, %v307_v2  ;;  %v588_v21 = vmax.f32 %v586_v6, %v587_v16  ;;  %v313_v2 = vld [vmem:[%s3387_s1 + $0x18] sm:$0xff]  ;;  %v312_v6 = vld [vmem:[%s3387_s1 + $0x10] sm:$0xff]  ;;  %v758_v15 = vrot.slane %v2202_v0, %v2377_v52  ;;  %s2888_s4 = sld [smem:[#allocation3 + $0x27]] }
  0x3e   : > { %v597_v22 = vmax.f32 %v595_v10, %v596_v18  ;;  %1996 = vmatpush3.msra.mxu0 %v313_v2  ;;  %v310_v10 = vld [vmem:[%s3387_s1] sm:$0xff]  ;;  %s2892_s11 = sld [smem:[#allocation3 + $0x44]] }
  0x3f   : > { %325 = vadd.xlane.f32.xlu1 %v324_v13  ;;  %v568_v23 = vadd.f32 %v567_v19, %v308_v7  ;;  %v577_v24 = vadd.f32 %v576_v20, %v309_v8  ;;  %v589_v25 = vrot.slane %v588_v21, 4  ;;  %1997 = vmatprep.subr.mxu0 %v2202_v0  ;;  %v311_v7 = vld [vmem:[%s3387_s1 + $0x8] sm:$0xff]  ;;  %v348_v20 = vand.u32 127, %v3370_v27  ;;  %s2884_s1 = sld [smem:[#allocation3 + $0x5]] }
  0x40   : > { %v598_v28 = vrot.slane %v597_v22, 4  ;;  %319 = vadd.xlane.f32.xlu0 %v318_v17  ;;  %1998 = vmatpush3.msra.mxu0 %v312_v6  ;;  %s2896_s28 = sld [smem:[#allocation3 + $0x13]] }
  0x41   : > { %v569_v32 = vrot.slane %v568_v23, 4  ;;  %v578_v33 = vrot.slane %v577_v24, 4  ;;  %v590_v34 = vmax.f32 %v588_v21, %v589_v25  ;;  %1999 = vmatprep.subr.mxu0 %v2202_v0  ;;  %v367_v29 = vadd.s32 4294967272, %v348_v20  ;;  %s2898_s8 = sld [smem:[#allocation3 + $0x3d]] }
  0x42   : > { %v599_v35 = vmax.f32 %v597_v22, %v598_v28  ;;  %2000 = vmatpush3.msra.mxu0 %v311_v7  ;;  %v353_v22 = vadd.s32 4294967288, %v348_v20  ;;  %s2900_s13 = sld [smem:[#allocation3 + $0xc]] }
  0x43   : > { %v570_v36 = vadd.f32 %v569_v32, %v568_v23  ;;  %v579_v37 = vadd.f32 %v578_v33, %v577_v24  ;;  %v591_v38 = vrot.slane %v590_v34, 2  ;;  %335 = vmax.xlane.f32.xlu1 %v334_v26  ;;  %2001 = vmatprep.subr.mxu0 %v2202_v0  ;;  %v360_v26 = vadd.s32 4294967280, %v348_v20  ;;  %s2905_s26 = sld [smem:[#allocation3 + $0x52]] }
  0x44   : > { %v600_v41 = vrot.slane %v599_v35, 2  ;;  %332 = vmax.xlane.f32.xlu0 %v331_v31  ;;  %2002 = vmatpush3.msra.mxu0 %v310_v10  ;;  %v356_v25 = vsub.s32 %v353_v22, %v2374_v40  ;;  %v351_v31 = vsub.s32 %v348_v20, %v2374_v40  ;;  %s2910_s29 = sld [smem:[#allocation3 + $0x21]] }
  0x45   : > { %v571_v44 = vrot.slane %v570_v36, 2  ;;  %v580_v45 = vrot.slane %v579_v37, 2  ;;  %v592_v46 = vmax.f32 %v590_v34, %v591_v38  ;;  %s2913_s6 = sld [smem:[#allocation3 + $0x4b]] }
  0x46   : > { %v601_v47 = vmax.f32 %v599_v35, %v600_v41 }
  0x47   : > { %v572_v48 = vadd.f32 %v571_v44, %v570_v36  ;;  %v581_v49 = vadd.f32 %v580_v45, %v579_v37  ;;  %v593_v50 = vrot.slane %v592_v46, 1  ;;  %341 = vmax.xlane.f32.xlu1 %v340_v39  ;;  %v363_v36 = vsub.s32 %v360_v26, %v2374_v40 }
  0x48   : > { %v602_v51 = vrot.slane %v601_v47, 1  ;;  %338 = vmax.xlane.f32.xlu0 %v337_v43  ;;  %v370_v37 = vsub.s32 %v367_v29, %v2374_v40 }
  0x49   : > { %v573_v53 = vrot.slane %v572_v48, 1  ;;  %v582_v54 = vrot.slane %v581_v49, 1  ;;  %v594_v55 = vmax.f32 %v592_v46, %v593_v50 }
  0x4a   : > { %v603_v56 = vmax.f32 %v601_v47, %v602_v51 }
  0x4b   : > { %v574_v57 = vadd.f32 %v573_v53, %v572_v48  ;;  %v583_v58 = vadd.f32 %v582_v54, %v581_v49  ;;  %v647_v59 = vcombine.low %v2202_v0, %v594_v55  ;;  %v2507_v54 = vld [vmem:[%s3358_s3] ss:$8 sm:$0x3] }
  0x4c   : > { %v661_v60 = vrot.slane %v603_v56, %v2377_v52  ;;  %v777_v13 = vcombine.low %v594_v55, %v603_v56 }
  0x4d   : > { %v584_v61 = vmul.f32 0.03125, %v574_v57  ;;  %v585_v62 = vmul.f32 0.03125, %v583_v58  ;;  %v654_v63 = vrot.slane %v647_v59, %v2377_v52 }
  0x4e   : > { %v2417_v16 = vrot.slane %v777_v13, %v2377_v52 }
  0x4f   : > { %v612_v1 = vcombine.low %v2202_v0, %v584_v61  ;;  %v626_v3 = vrot.slane %v585_v62, %v2377_v52  ;;  %v662_v4 = vcombine.low %v654_v63, %v661_v60  ;;  %v744_v12 = vcombine.low %v584_v61, %v585_v62 }
  0x50   : > { %v785_v18 = vcombine.low %v2417_v16, %v758_v15 }
  0x51   : > { %v619_v5 = vrot.slane %v612_v1, %v2377_v52  ;;  %v2397_v9 = vrot.slane %v662_v4, %v2377_v52  ;;  %v2411_v14 = vrot.slane %v744_v12, %v2377_v52 }
  0x52   : > { %v2429_v0 = vrot.slane %v785_v18, %v2377_v52 }
  0x53   : > { %v627_v8 = vcombine.low %v619_v5, %v626_v3  ;;  %v759_v17 = vcombine.low %v2411_v14, %v758_v15 }
  0x55   : > { %v2406_v11 = vrot.slane %v627_v8, %v2377_v52  ;;  %v2425_v19 = vrot.slane %v759_v17, %v2377_v52 }
  0x58   : > { %670 = vrot.lane.b32.xlu1 %v2397_v9, %s2205_s18 }
  0x5c   : > { %681 = vrot.lane.b32.xlu1 %v2406_v11, %s2206_s19 }
  0x5e   : > { %635 = vrot.lane.b32.xlu0 %v2406_v11, %s2205_s18  ;;  %s2219_s18 = smov 49  }
  0x60   : > { %691 = vrot.lane.b32.xlu1 %v2397_v9, %s2206_s19  ;;  %s2220_s19 = smov 17  }
  0x62   : > { %702 = vrot.lane.b32.xlu0 %v2406_v11, %s2207_s21 }
  0x64   : > { %712 = vrot.lane.b32.xlu1 %v2397_v9, %s2207_s21  ;;  %s2221_s21 = smov 113  }
  0x66   : > { %723 = vrot.lane.b32.xlu0 %v2406_v11, %s2208_s22 }
  0x68   : > { %733 = vrot.lane.b32.xlu1 %v2397_v9, %s2208_s22  ;;  %s2222_s22 = smov 81  }
  0x6a   : > { %767 = vrot.lane.b32.xlu0 %v2425_v19, %s2209_s23 }
  0x6c   : > { %793 = vrot.lane.b32.xlu1 %v2429_v0, %s2209_s23  ;;  %s2223_s23 = smov 48  }
  0x6e   : > { %804 = vrot.lane.b32.xlu0 %v2425_v19, %s2210_s24 }
  0x70   : > { %814 = vrot.lane.b32.xlu1 %v2429_v0, %s2210_s24  ;;  %s2224_s24 = smov 33  }
  0x72   : > { %825 = vrot.lane.b32.xlu0 %v2425_v19, %s2211_s25 }
  0x74   : > { %835 = vrot.lane.b32.xlu1 %v2429_v0, %s2211_s25  ;;  %s2225_s25 = smov 16  }
  0x76   : > { %848 = vrot.lane.b32.xlu0 %v2406_v11, %s2212_s30 }
  0x78   : > { %858 = vrot.lane.b32.xlu1 %v2397_v9, %s2212_s30  ;;  %s2226_s30 = smov 1  }
  0x7a   : > { %869 = vrot.lane.b32.xlu0 %v2406_v11, %s2213_s9 }
  0x7c   : > { %879 = vrot.lane.b32.xlu1 %v2397_v9, %s2213_s9  ;;  %s2227_s9 = smov 112  }
  0x7e   : > { %890 = vrot.lane.b32.xlu0 %v2406_v11, %s2214_s10 }
  0x80   : > { %900 = vrot.lane.b32.xlu1 %v2397_v9, %s2214_s10  ;;  %s2228_s10 = smov 97  }
  0x82   : > { %911 = vrot.lane.b32.xlu0 %v2406_v11, %s2215_s14 }
  0x84   : > { %920 = vrot.lane.b32.xlu1 %v2397_v9, %s2215_s14  ;;  %s2229_s14 = smov 80  }
  0x86   : > { %931 = vrot.lane.b32.xlu0 %v2425_v19, %s2216_s15 }
  0x88   : > { %941 = vrot.lane.b32.xlu1 %v2429_v0, %s2216_s15  ;;  %s2230_s15 = smov 32  }
  0x8a   : > { %952 = vrot.lane.b32.xlu0 %v2425_v19, %s2217_s16 }
  0x8c   : > { %973 = vrot.lane.b32.xlu1 %v2425_v19, %s2218_s17 }
  0x8e   : > { %983 = vrot.lane.b32.xlu0 %v2429_v0, %s2218_s17  ;;  %s2232_s17 = smov 15  }
  0x90   : > { %996 = vrot.lane.b32.xlu1 %v2406_v11, %s2219_s18 }
  0x92   : > { %1006 = vrot.lane.b32.xlu0 %v2397_v9, %s2219_s18  ;;  %s2233_s18 = smov 96  }
  0x94   : > { %1038 = vrot.lane.b32.xlu1 %v2406_v11, %s2220_s19 }
  0x96   : > { %1048 = vrot.lane.b32.xlu0 %v2397_v9, %s2220_s19  ;;  %s2486_s19 = sld [smem:[#allocation3]] }
  0x98   : > { %1080 = vrot.lane.b32.xlu1 %v2425_v19, %s2221_s21 }
  0x9a   : > { %1090 = vrot.lane.b32.xlu0 %v2429_v0, %s2221_s21  ;;  %s2234_s21 = smov 111  }
  0x9c   : > { %1122 = vrot.lane.b32.xlu1 %v2425_v19, %s2222_s22  ;;  %v607_v56 = vstv %s2486_s19  ;;  %s2237_s19 = smov 127  }
  0x9d   : > { %v608_v63 = vmul.f32 %v607_v56, %v2507_v54 }
  0x9e   : > { %1132 = vrot.lane.b32.xlu0 %v2429_v0, %s2222_s22  ;;  %s2490_s22 = sld [smem:[#allocation3 + $0xe]] }
  0xa0   : > { %962 = vrot.lane.b32.xlu1 %v2429_v0, %s2217_s16  ;;  %s2231_s16 = smov 47  }
  0xa2   : > { %1145 = vrot.lane.b32.xlu0 %v2406_v11, %s2223_s23 }
  0xa4   : > { %1155 = vrot.lane.b32.xlu1 %v2397_v9, %s2223_s23  ;;  %s2493_s23 = sld [smem:[#allocation3 + $0x7]]  ;;  %v700_v62 = vstv %s2490_s22 }
  0xa5   : > { %v701_v5 = vmul.f32 %v700_v62, %v2507_v54  ;;  %s2538_s22 = sld [smem:[#allocation3 + $0x4d]] }
  0xa6   : > { %1017 = vrot.lane.b32.xlu0 %v2406_v11, %s2224_s24 }
  0xa8   : > { %1027 = vrot.lane.b32.xlu1 %v2397_v9, %s2224_s24  ;;  %s2235_s24 = smov 31  }
  0xaa   : > { %1186 = vrot.lane.b32.xlu0 %v2406_v11, %s2225_s25  ;;  %v679_v1 = vstv %s2493_s23  ;;  %s2238_s23 = smov 46  }
  0xab   : > { %v680_v13 = vmul.f32 %v679_v1, %v2507_v54  ;;  %v775_v56 = vstv %s2538_s22  ;;  %s2595_s22 = sld [smem:[#allocation3 + $0x39]] }
  0xac   : > { %1196 = vrot.lane.b32.xlu1 %v2397_v9, %s2225_s25  ;;  %s2498_s25 = sld [smem:[#allocation3 + $0x15]] }
  0xae   : > { %1059 = vrot.lane.b32.xlu0 %v2406_v11, %s2226_s30 }
  0xb0   : > { %1069 = vrot.lane.b32.xlu1 %v2397_v9, %s2226_s30  ;;  %s2501_s30 = sld [smem:[#allocation3 + $0x31]] }
  0xb2   : > { %1233 = vrot.lane.b32.xlu0 %v2425_v19, %s2227_s9  ;;  %v721_v8 = vstv %s2498_s25  ;;  %s2552_s25 = sld [smem:[#allocation3 + $0x54]] }
  0xb4   : > { %1243 = vrot.lane.b32.xlu1 %v2429_v0, %s2227_s9  ;;  %s2557_s9 = sld [smem:[#allocation3 + $0x1]] }
  0xb6   : > { %1101 = vrot.lane.b32.xlu0 %v2425_v19, %s2228_s10  ;;  %v643_v10 = vstv %s2501_s30  ;;  %s2239_s30 = smov 95  }
  0xb8   : > { %1111 = vrot.lane.b32.xlu1 %v2429_v0, %s2228_s10  ;;  %s2566_s10 = sld [smem:[#allocation3 + $0x5b]] }
  0xba   : > { %1275 = vrot.lane.b32.xlu0 %v2425_v19, %s2229_s14 }
  0xbc   : > { %1285 = vrot.lane.b32.xlu1 %v2429_v0, %s2229_s14  ;;  %s2509_s14 = sld [smem:[#allocation3 + $0x38]] }
  0xbe   : > { %1166 = vrot.lane.b32.xlu0 %v2406_v11, %s2230_s15 }
  0xc0   : > { %1175 = vrot.lane.b32.xlu1 %v2397_v9, %s2230_s15  ;;  %s2513_s15 = sld [smem:[#allocation3 + $0x3f]] }
  0xc2   : > { %1298 = vrot.lane.b32.xlu0 %v2406_v11, %s2231_s16  ;;  %v689_v26 = vstv %s2509_s14  ;;  %s2240_s14 = smov 14  }
  0xc4   : > { %v323_v21 = vpop.xlane.xlu1 %322  ;;  %1308 = vrot.lane.b32.xlu1 %v2397_v9, %s2231_s16  ;;  %s2236_s16 = smov 79  }
  0xc5   : > { %v317_v23 = vpop.xlane.xlu0 %316  ;;  %v329_v33 = vmul.f32 0.00390625, %v323_v21 }
  0xc6   : > { %1340 = vrot.lane.b32.xlu0 %v2406_v11, %s2232_s17  ;;  %v327_v28 = vmul.f32 0.00390625, %v317_v23  ;;  %v710_v21 = vstv %s2513_s15  ;;  %v722_v23 = vmul.f32 %v721_v8, %v2507_v54  ;;  %s2570_s15 = sld [smem:[#allocation3 + $0x8]]  ;;  %v812_v8 = vstv %s2552_s25 }
  0xc7   : > { %v364_v45 = vrot.slane %v329_v33, %v363_v36  ;;  %s2607_s25 = sld [smem:[#allocation3 + $0x40]] }
  0xc8   : > { %v326_v24 = vpop.xlane.xlu1 %325  ;;  %1350 = vrot.lane.b32.xlu1 %v2397_v9, %s2232_s17  ;;  %v352_v39 = vrot.slane %v327_v28, %v351_v31  ;;  %s2517_s17 = sld [smem:[#allocation3 + $0x1c]] }
  0xc9   : > { %v320_v30 = vpop.xlane.xlu0 %319  ;;  %v330_v38 = vmul.f32 0.00390625, %v326_v24 }
  0xca   : > { %v328_v32 = vmul.f32 0.00390625, %v320_v30  ;;  %1254 = vrot.lane.b32.xlu0 %v2425_v19, %s2233_s18 }
  0xcb   : > { %v371_v40 = vrot.slane %v330_v38, %v370_v37 }
  0xcc   : > { %v357_v34 = vrot.slane %v328_v32, %v356_v25  ;;  %v336_v35 = vpop.xlane.xlu1 %335  ;;  %1264 = vrot.lane.b32.xlu1 %v2429_v0, %s2233_s18  ;;  %s2525_s18 = sld [smem:[#allocation3 + $0x46]] }
  0xcd   : > { %v333_v41 = vpop.xlane.xlu0 %332  ;;  %v386_v42 = vrot.slane %v336_v35, %v356_v25  ;;  %v644_v25 = vmul.f32 %v643_v10, %v2507_v54 }
  0xce   : > { %1382 = vrot.lane.b32.xlu0 %v2425_v19, %s2234_s21  ;;  %v359_v43 = vsel %vm358_vm1, %v357_v34, %v352_v39  ;;  %v382_v44 = vrot.slane %v333_v41, %v351_v31  ;;  %v742_v29 = vstv %s2517_s17  ;;  %v711_v34 = vmul.f32 %v710_v21, %v2507_v54  ;;  %s2245_s17 = smov 94  }
  0xcf   : > { %v366_v50 = vsel %vm365_vm2, %v364_v45, %v359_v43  ;;  %v743_v41 = vmul.f32 %v742_v29, %v2507_v54  ;;  %v833_v29 = vstv %s2566_s10  ;;  %s2619_s10 = sld [smem:[#allocation3 + $0x47]] }
  0xd0   : > { %v342_v46 = vpop.xlane.xlu1 %341  ;;  %1392 = vrot.lane.b32.xlu1 %v2429_v0, %s2234_s21  ;;  %v387_v51 = vsel %vm358_vm1, %v386_v42, %v382_v44  ;;  %v373_v57 = vsel %vm372_vm3, %v371_v40, %v366_v50  ;;  %s2529_s21 = sld [smem:[#allocation3 + $0x23]]  ;;  %v690_v44 = vmul.f32 %v689_v26, %v2507_v54  ;;  %vm934_vm1 = vcmask 932864  }
  0xd1   : > { %v339_v47 = vpop.xlane.xlu0 %338  ;;  %v396_v48 = vrot.slane %v342_v46, %v370_v37 }
  0xd2   : > { %v391_v49 = vrot.slane %v339_v47, %v363_v36  ;;  %1319 = vrot.lane.b32.xlu0 %v2406_v11, %s2235_s24  ;;  %v731_v38 = vstv %s2525_s18  ;;  %s2635_s18 = sld [smem:[#allocation3 + $0x5c]] }
  0xd3   : > { %v732_v50 = vmul.f32 %v731_v38, %v2507_v54 }
  0xd4   : > { %v392_v53 = vsel %vm365_vm2, %v391_v49, %v387_v51  ;;  %v671_v55 = vpop.permute.xlu1 %670  ;;  %1329 = vrot.lane.b32.xlu1 %v2397_v9, %s2235_s24  ;;  %s2544_s24 = sld [smem:[#allocation3 + $0x2a]]  ;;  %vm955_vm2 = vcmask 801792  }
  0xd5   : > { %v397_v58 = vsel %vm372_vm3, %v396_v48, %v392_v53  ;;  %v636_v59 = vpop.permute.xlu0 %635  ;;  %v672_v12 = vrot.slane %v671_v55, 1  ;;  %vm976_vm3 = vcmask 670720  }
  0xd6   : > { %v400_v60 = vsel %vm399_vm4, %v373_v57, %v397_v58  ;;  %v637_v61 = vrot.slane %v636_v59, 1  ;;  %1424 = vrot.lane.b32.xlu0 %v2425_v19, %s2236_s16  ;;  %v802_v46 = vstv %s2529_s21  ;;  %s2587_s21 = sld [smem:[#allocation3 + $0xf]]  ;;  %vm999_vm4 = vcmask 400384  }
  0xd7   : > { %2004 = vmatmul.mubr.msk.f32.vlgmr.msra.gmra.mxu0 %vm401_vm5, %v400_v60  ;;  %v673_v30 = vsel %vm638_vm6, %v671_v55, %v672_v12  ;;  %v803_v58 = vmul.f32 %v802_v46, %v2507_v54 }
  0xd8   : > { %v682_v2 = vpop.permute.xlu1 %681  ;;  %v639_v3 = vsel %vm638_vm6, %v636_v59, %v637_v61  ;;  %1434 = vrot.lane.b32.xlu1 %v2429_v0, %s2236_s16  ;;  %v675_v43 = vmul.f32 %v673_v30, %v644_v25  ;;  %s2578_s16 = sld [smem:[#allocation3 + $0x32]]  ;;  %vm1041_vm6 = vcmask 138240  }
  0xd9   : > { %v683_v4 = vrot.slane %v682_v2, 1  ;;  %v703_v6 = vpop.permute.xlu0 %702  ;;  %v641_v15 = vmul.f32 %v639_v3, %v608_v63 }
  0xda   : > { %v704_v7 = vrot.slane %v703_v6, 1  ;;  %1361 = vrot.lane.b32.xlu0 %v2425_v19, %s2237_s19  ;;  %v823_v63 = vstv %s2544_s24  ;;  %s2599_s24 = sld [smem:[#allocation3 + $0x16]] }
  0xdb   : > { %v685_v17 = vsel %vm684_vm7, %v682_v2, %v683_v4  ;;  %v776_v4 = vmul.f32 %v775_v56, %v2507_v54  ;;  %v824_v12 = vmul.f32 %v823_v63, %v2507_v54 }
  0xdc   : > { %v692_v18 = vpop.permute.xlu1 %691  ;;  %v706_v20 = vsel %vm705_vm8, %v703_v6, %v704_v7  ;;  %1371 = vrot.lane.b32.xlu1 %v2429_v0, %s2237_s19  ;;  %v687_v31 = vmul.f32 %v685_v17, %v680_v13  ;;  %s2241_s19 = smov 30  }
  0xdd   : > { %v708_v22 = vmul.f32 %v706_v20, %v701_v5  ;;  %v724_v24 = vpop.permute.xlu0 %723  ;;  %v693_v32 = vrot.slane %v692_v18, 1  ;;  %v846_v20 = vstv %s2557_s9  ;;  %s2611_s9 = sld [smem:[#allocation3 + $0x1d]] }
  0xde   : > { %v725_v28 = vrot.slane %v724_v24, 1  ;;  %1447 = vrot.lane.b32.xlu0 %v2406_v11, %s2238_s23 }
  0xdf   : > { %v709_v33 = vadd.f32 %v708_v22, %v641_v15  ;;  %v694_v40 = vsel %vm684_vm7, %v692_v18, %v693_v32  ;;  %v2583_v18 = vld [vmem:[%s3358_s3 + $0x1] ss:$8 sm:$0x3]  ;;  %vm1083_vm7 = vcmask 924672  }
  0xe0   : > { %v713_v35 = vpop.permute.xlu1 %712  ;;  %v727_v36 = vsel %vm726_vm9, %v724_v24, %v725_v28  ;;  %1457 = vrot.lane.b32.xlu1 %v2397_v9, %s2238_s23  ;;  %v696_v60 = vmul.f32 %v694_v40, %v690_v44  ;;  %v813_v24 = vmul.f32 %v812_v8, %v2507_v54  ;;  %s2242_s23 = smov 110   ;;  %v856_v44 = vstv %s2578_s16  ;;  %s2629_s16 = sld [smem:[#allocation3 + $0x4e]] }
  0xe1   : > { %v714_v37 = vrot.slane %v713_v35, 1  ;;  %v729_v39 = vmul.f32 %v727_v36, %v722_v23  ;;  %v768_v42 = vpop.permute.xlu0 %767 }
  0xe2   : > { %v769_v45 = vrot.slane %v768_v42, 1  ;;  %1403 = vrot.lane.b32.xlu0 %v2425_v19, %s2239_s30 }
  0xe3   : > { %v715_v47 = vsel %vm705_vm8, %v713_v35, %v714_v37  ;;  %v730_v48 = vadd.f32 %v729_v39, %v687_v31  ;;  %v847_v31 = vmul.f32 %v2583_v18, %v846_v20  ;;  %v867_v35 = vstv %s2570_s15  ;;  %s2623_s15 = sld [smem:[#allocation3 + $0x24]] }
  0xe4   : > { %v717_v49 = vmul.f32 %v715_v47, %v711_v34  ;;  %v734_v51 = vpop.permute.xlu1 %733  ;;  %v771_v53 = vsel %vm770_vm10, %v768_v42, %v769_v45  ;;  %1413 = vrot.lane.b32.xlu1 %v2429_v0, %s2239_s30  ;;  %v834_v39 = vmul.f32 %v833_v29, %v2507_v54  ;;  %v868_v46 = vmul.f32 %v2583_v18, %v867_v35  ;;  %s2243_s30 = smov 126  }
  0xe5   : > { %v735_v55 = vrot.slane %v734_v51, 1  ;;  %v773_v57 = vmul.f32 %v771_v53, %v743_v41  ;;  %v805_v59 = vpop.permute.xlu0 %804  ;;  %v857_v53 = vmul.f32 %v2583_v18, %v856_v44  ;;  %vm1125_vm8 = vcmask 662528  }
  0xe6   : > { %v718_v61 = vadd.f32 %v717_v49, %v675_v43  ;;  %v806_v62 = vrot.slane %v805_v59, 1  ;;  %1489 = vrot.lane.b32.xlu0 %v2406_v11, %s2240_s14  ;;  %v888_v49 = vstv %s2587_s21  ;;  %s2246_s21 = smov 45  }
  0xe7   : > { %v736_v1 = vsel %vm726_vm9, %v734_v51, %v735_v55  ;;  %v774_v2 = vadd.f32 %v773_v57, %v709_v33  ;;  %vm1148_vm9 = vcmask 392192  }
  0xe8   : > { %v738_v3 = vmul.f32 %v736_v1, %v732_v50  ;;  %v794_v5 = vpop.permute.xlu1 %793  ;;  %v808_v6 = vsel %vm807_vm11, %v805_v59, %v806_v62  ;;  %1499 = vrot.lane.b32.xlu1 %v2397_v9, %s2240_s14  ;;  %v909_v1 = vstv %s2599_s24  ;;  %s2244_s14 = smov 78   ;;  %s2247_s24 = smov 29  }
  0xe9   : > { %v795_v7 = vrot.slane %v794_v5, 1  ;;  %v810_v10 = vmul.f32 %v808_v6, %v803_v58  ;;  %v826_v13 = vpop.permute.xlu0 %825  ;;  %v877_v58 = vstv %s2595_s22  ;;  %s2647_s22 = sld [smem:[#allocation3 + $0x33]] }
  0xea   : > { %v739_v15 = vadd.f32 %v738_v3, %v696_v60  ;;  %v827_v17 = vrot.slane %v826_v13, 1  ;;  %1468 = vrot.lane.b32.xlu0 %v2406_v11, %s2241_s19  ;;  %v889_v60 = vmul.f32 %v2583_v18, %v888_v49 }
  0xeb   : > { %v796_v21 = vsel %vm770_vm10, %v794_v5, %v795_v7  ;;  %v811_v22 = vadd.f32 %v810_v10, %v730_v48  ;;  %v878_v5 = vmul.f32 %v2583_v18, %v877_v58  ;;  %v898_v10 = vstv %s2607_s25  ;;  %s2659_s25 = sld [smem:[#allocation3 + $0x41]] }
  0xec   : > { %v798_v23 = vmul.f32 %v796_v21, %v776_v4  ;;  %v815_v25 = vpop.permute.xlu1 %814  ;;  %v829_v26 = vsel %vm828_vm12, %v826_v13, %v827_v17  ;;  %1478 = vrot.lane.b32.xlu1 %v2397_v9, %s2241_s19  ;;  %v910_v13 = vmul.f32 %v2583_v18, %v909_v1  ;;  %v929_v21 = vstv %s2611_s9  ;;  %s2643_s19 = sld [smem:[#allocation3 + $0x2b]]  ;;  %v2674_v1 = vld [vmem:[%s3358_s3 + $0x2] ss:$8 sm:$0x3] }
  0xed   : > { %v816_v28 = vrot.slane %v815_v25, 1  ;;  %v831_v30 = vmul.f32 %v829_v26, %v824_v12  ;;  %v849_v32 = vpop.permute.xlu0 %848  ;;  %vm480_vm10 = vcmask 1041408   ;;  %s2786_s9 = sld [smem:[#allocation3 + $0x56]] }
  0xee   : > { %v799_v33 = vadd.f32 %v798_v23, %v718_v61  ;;  %v850_v34 = vrot.slane %v849_v32, 1  ;;  %1531 = vrot.lane.b32.xlu0 %v2425_v19, %s2242_s23 }
  0xef   : > { %v817_v36 = vsel %vm807_vm11, %v815_v25, %v816_v28  ;;  %v832_v37 = vadd.f32 %v831_v30, %v774_v2  ;;  %v899_v25 = vmul.f32 %v2583_v18, %v898_v10  ;;  %v918_v30 = vstv %s2619_s10  ;;  %s2789_s10 = sld [smem:[#allocation3 + $0xa]] }
  0xf0   : > { %v819_v38 = vmul.f32 %v817_v36, %v813_v24  ;;  %v836_v41 = vpop.permute.xlu1 %835  ;;  %v852_v42 = vsel %vm851_vm13, %v849_v32, %v850_v34  ;;  %1541 = vrot.lane.b32.xlu1 %v2429_v0, %s2242_s23  ;;  %v930_v32 = vmul.f32 %v2583_v18, %v929_v21  ;;  %v950_v36 = vstv %s2623_s15  ;;  %s2655_s23 = sld [smem:[#allocation3 + $0x2]] }
  0xf1   : > { %v837_v43 = vrot.slane %v836_v41, 1  ;;  %v854_v45 = vmul.f32 %v852_v42, %v847_v31  ;;  %v870_v40 = vpop.permute.xlu0 %869  ;;  %s2678_s15 = sld [smem:[#allocation3 + $0x4f]]  ;;  %vm1020_vm11 = vcmask 269312  }
  0xf2   : > { %v820_v47 = vadd.f32 %v819_v38, %v739_v15  ;;  %v871_v48 = vrot.slane %v870_v40, 1  ;;  %1510 = vrot.lane.b32.xlu0 %v2425_v19, %s2243_s30 }
  0xf3   : > { %v838_v54 = vsel %vm828_vm12, %v836_v41, %v837_v43  ;;  %v855_v50 = vadd.f32 %v854_v45, %v832_v37  ;;  %v919_v41 = vmul.f32 %v2583_v18, %v918_v30  ;;  %v939_v43 = vstv %s2629_s16  ;;  %s2688_s16 = sld [smem:[#allocation3 + $0x1e]] }
  0xf4   : > { %v840_v51 = vmul.f32 %v838_v54, %v834_v39  ;;  %v859_v55 = vpop.permute.xlu1 %858  ;;  %v873_v56 = vsel %vm872_vm14, %v870_v40, %v871_v48  ;;  %1520 = vrot.lane.b32.xlu1 %v2429_v0, %s2243_s30  ;;  %v951_v40 = vmul.f32 %v2583_v18, %v950_v36  ;;  %v981_v54 = vstv %s2635_s18  ;;  %s2667_s30 = sld [smem:[#allocation3 + $0x10]] }
  0xf5   : > { %v860_v57 = vrot.slane %v859_v55, 1  ;;  %v875_v59 = vmul.f32 %v873_v56, %v868_v46  ;;  %v891_v61 = vpop.permute.xlu0 %890  ;;  %s2692_s18 = sld [smem:[#allocation3 + $0x5d]]  ;;  %vm1189_vm12 = vcmask 130048  }
  0xf6   : > { %v841_v62 = vadd.f32 %v840_v51, %v799_v33  ;;  %v892_v63 = vrot.slane %v891_v61, 1  ;;  %1573 = vrot.lane.b32.xlu0 %v2425_v19, %s2244_s14 }
  0xf7   : > { %v861_v2 = vsel %vm851_vm13, %v859_v55, %v860_v57  ;;  %v876_v3 = vadd.f32 %v875_v59, %v811_v22  ;;  %v940_v55 = vmul.f32 %v2583_v18, %v939_v43  ;;  %v971_v59 = vstv %s2643_s19  ;;  %s2698_s19 = sld [smem:[#allocation3 + $0x2c]] }
  0xf8   : > { %v863_v4 = vmul.f32 %v861_v2, %v857_v53  ;;  %v880_v6 = vpop.permute.xlu1 %879  ;;  %v894_v7 = vsel %vm893_vm15, %v891_v61, %v892_v63  ;;  %1583 = vrot.lane.b32.xlu1 %v2429_v0, %s2244_s14  ;;  %v982_v61 = vmul.f32 %v2583_v18, %v981_v54  ;;  %s2248_s14 = smov 13   ;;  %v1088_v36 = vstv %s2678_s15  ;;  %s2733_s15 = sld [smem:[#allocation3 + $0x11]] }
  0xf9   : > { %v881_v8 = vrot.slane %v880_v6, 1  ;;  %v896_v12 = vmul.f32 %v894_v7, %v889_v60  ;;  %v912_v15 = vpop.permute.xlu0 %911  ;;  %v972_v7 = vmul.f32 %v2583_v18, %v971_v59  ;;  %vm1062_vm13 = vcmask 7168  }
  0xfa   : > { %v864_v17 = vadd.f32 %v863_v4, %v841_v62  ;;  %v913_v20 = vrot.slane %v912_v15, 1  ;;  %1552 = vrot.lane.b32.xlu0 %v2425_v19, %s2245_s17  ;;  %v1036_v30 = vstv %s2667_s30  ;;  %s2723_s30 = sld [smem:[#allocation3 + $0x34]] }
  0xfb   : > { %v882_v22 = vsel %vm872_vm14, %v880_v6, %v881_v8  ;;  %v897_v23 = vadd.f32 %v896_v12, %v855_v50  ;;  %v1130_v54 = vstv %s2692_s18  ;;  %s2744_s18 = sld [smem:[#allocation3 + $0x3a]]  ;;  %vm1236_vm14 = vcmask 916480  }
  0xfc   : > { %v884_v24 = vmul.f32 %v882_v22, %v878_v5  ;;  %v901_v26 = vpop.permute.xlu1 %900  ;;  %v914_v28 = vsel %vm476_vm0, %v912_v15, %v913_v20  ;;  %1562 = vrot.lane.b32.xlu1 %v2429_v0, %s2245_s17  ;;  %v1046_v22 = vstv %s2659_s25  ;;  %s2249_s17 = smov 125   ;;  %s2716_s25 = sld [smem:[#allocation3 + $0x9]] }
  0xfd   : > { %v902_v29 = vrot.slane %v901_v26, 1  ;;  %v916_v31 = vmul.f32 %v914_v28, %v910_v13  ;;  %v932_v33 = vpop.permute.xlu0 %931  ;;  %v994_v13 = vstv %s2655_s23  ;;  %s2712_s23 = sld [smem:[#allocation3 + $0x55]] }
  0xfe   : > { %v885_v34 = vadd.f32 %v884_v24, %v820_v47  ;;  %v933_v35 = vrot.slane %v932_v33, 1  ;;  %1596 = vrot.lane.b32.xlu0 %v2406_v11, %s2246_s21  ;;  %v995_v24 = vmul.f32 %v2674_v1, %v994_v13 }
  0xff   : > { %v903_v37 = vsel %vm893_vm15, %v901_v26, %v902_v29  ;;  %v917_v38 = vadd.f32 %v916_v31, %v876_v3  ;;  %v1004_v3 = vstv %s2647_s22  ;;  %s2704_s22 = sld [smem:[#allocation3 + $0x3]]  ;;  %vm1104_vm15 = vcmask 793600  }
 0x100   : > { %v905_v39 = vmul.f32 %v903_v37, %v899_v25  ;;  %v921_v42 = vpop.permute.xlu1 %920  ;;  %v935_v44 = vsel %vm934_vm1, %v932_v33, %v933_v35  ;;  %1606 = vrot.lane.b32.xlu1 %v2397_v9, %s2246_s21  ;;  %s2250_s21 = smov 109  }
 0x101   : > { %v922_v45 = vrot.slane %v921_v42, 1  ;;  %v937_v46 = vmul.f32 %v935_v44, %v930_v32  ;;  %v953_v47 = vpop.permute.xlu0 %952  ;;  %v1047_v32 = vmul.f32 %v2674_v1, %v1046_v22 }
 0x102   : > { %v906_v48 = vadd.f32 %v905_v39, %v864_v17  ;;  %v954_v49 = vrot.slane %v953_v47, 1  ;;  %1617 = vrot.lane.b32.xlu0 %v2406_v11, %s2247_s24 }
 0x103   : > { %v923_v50 = vsel %vm476_vm0, %v921_v42, %v922_v45  ;;  %v938_v51 = vadd.f32 %v937_v46, %v897_v23  ;;  %v1078_v45 = vstv %s2688_s16  ;;  %s2806_s16 = sld [smem:[#allocation3 + $0x3b]] }
 0x104   : > { %v925_v53 = vmul.f32 %v923_v50, %v919_v41  ;;  %v942_v56 = vpop.permute.xlu1 %941  ;;  %v956_v57 = vsel %vm955_vm2, %v953_v47, %v954_v49  ;;  %1627 = vrot.lane.b32.xlu1 %v2397_v9, %s2247_s24  ;;  %v1037_v41 = vmul.f32 %v2674_v1, %v1036_v30  ;;  %s2251_s24 = smov 93   ;;  %v1153_v30 = vstv %s2723_s30  ;;  %s2779_s30 = sld [smem:[#allocation3 + $0x2d]] }
 0x105   : > { %v943_v58 = vrot.slane %v942_v56, 1  ;;  %v958_v60 = vmul.f32 %v956_v57, %v951_v40  ;;  %v984_v62 = vpop.permute.xlu0 %983  ;;  %v1089_v40 = vmul.f32 %v2674_v1, %v1088_v36  ;;  %v1120_v57 = vstv %s2698_s19  ;;  %s2747_s19 = sld [smem:[#allocation3 + $0x17]] }
 0x106   : > { %v2669_v63 = vadd.f32 %v925_v53, %v885_v34  ;;  %v985_v2 = vrot.slane %v984_v62, 1  ;;  %1638 = vrot.lane.b32.xlu0 %v2406_v11, %s2248_s14  ;;  %v1005_v11 = vmul.f32 %v2674_v1, %v1004_v3 }
 0x107   : > { %v944_v4 = vsel %vm934_vm1, %v942_v56, %v943_v58  ;;  %v2681_v5 = vadd.f32 %v958_v60, %v917_v38  ;;  %vm1278_vm1 = vcmask 654336  }
 0x108   : > { %v946_v6 = vmul.f32 %v944_v4, %v940_v55  ;;  %v974_v8 = vpop.permute.xlu1 %973  ;;  %v986_v10 = vsel %vm976_vm3, %v984_v62, %v985_v2  ;;  %1648 = vrot.lane.b32.xlu1 %v2397_v9, %s2248_s14  ;;  %v1079_v55 = vmul.f32 %v2674_v1, %v1078_v45  ;;  %v2729_v4 = vld [vmem:[%s3358_s3 + $0x3] ss:$8 sm:$0x3]  ;;  %s2252_s14 = smov 77  }
 0x109   : > { %v975_v12 = vrot.slane %v974_v8, 1  ;;  %v988_v15 = vmul.f32 %v986_v10, %v982_v61  ;;  %v1007_v17 = vpop.permute.xlu0 %1006  ;;  %v1131_v61 = vmul.f32 %v2674_v1, %v1130_v54 }
 0x10a   : > { %v947_v20 = vadd.f32 %v946_v6, %v906_v48  ;;  %v1008_v21 = vrot.slane %v1007_v17, 1  ;;  %1659 = vrot.lane.b32.xlu0 %v2425_v19, %s2249_s17  ;;  %v1143_v6 = vstv %s2704_s22  ;;  %s2757_s22 = sld [smem:[#allocation3 + $0x1f]] }
 0x10b   : > { %v977_v23 = vsel %vm976_vm3, %v974_v8, %v975_v12  ;;  %v1121_v8 = vmul.f32 %v2674_v1, %v1120_v57  ;;  %vm1257_vm3 = vcmask 785408  }
 0x10c   : > { %v979_v9 = vmul.f32 %v977_v23, %v972_v7  ;;  %v997_v25 = vpop.permute.xlu1 %996  ;;  %v989_v26 = vadd.f32 %v988_v15, %v947_v20  ;;  %v1009_v28 = vsel %vm999_vm4, %v1007_v17, %v1008_v21  ;;  %1669 = vrot.lane.b32.xlu1 %v2429_v0, %s2249_s17  ;;  %v960_v17 = vstv %s2712_s23  ;;  %s2764_s23 = sld [smem:[#allocation3 + $0x48]] }
 0x10d   : > { %v998_v29 = vrot.slane %v997_v25, 1  ;;  %v1011_v31 = vmul.f32 %v1009_v28, %v1005_v11  ;;  %v1049_v33 = vpop.permute.xlu0 %1048  ;;  %v314_v11 = vld [vmem:[%s3388_s2] sm:$0x3]  ;;  %v1144_v21 = vmul.f32 %v2729_v4, %v1143_v6  ;;  %v961_v28 = vmul.f32 %v2583_v18, %v960_v17  ;;  %s2814_s17 = sld [smem:[#allocation3 + $0x35]] }
 0x10e   : > { %v980_v34 = vadd.f32 %v979_v9, %v938_v51  ;;  %v1050_v35 = vrot.slane %v1049_v33, 1  ;;  %1680 = vrot.lane.b32.xlu0 %v2425_v19, %s2250_s21  ;;  %2007 = vmatpush3.msk.msra.mxu1 %vm480_vm10, %v314_v11  ;;  %s2886_s2 = sld [smem:[#allocation3 + $0x58]]  ;;  %vm1406_vm10 = vcmask 777216  }
 0x10f   : > { %v1000_v37 = vsel %vm999_vm4, %v997_v25, %v998_v29  ;;  %v1012_v38 = vadd.f32 %v1011_v31, %v989_v26  ;;  %vm1385_vm4 = vcmask 908288  }
 0x110   : > { %v1002_v39 = vmul.f32 %v1000_v37, %v995_v24  ;;  %v1039_v42 = vpop.permute.xlu1 %1038  ;;  %v1051_v43 = vsel %vm1041_vm6, %v1049_v33, %v1050_v35  ;;  %1690 = vrot.lane.b32.xlu1 %v2429_v0, %s2250_s21  ;;  %v1015_v24 = vstv %s2716_s25  ;;  %s2754_s21 = sld [smem:[#allocation3 + $0x42]]  ;;  %v1231_v6 = vstv %s2757_s22 }
 0x111   : > { %v1040_v44 = vrot.slane %v1039_v42, 1  ;;  %v1053_v46 = vmul.f32 %v1051_v43, %v1047_v32  ;;  %v1091_v47 = vpop.permute.xlu0 %1090  ;;  %s2776_s25 = sld [smem:[#allocation3 + $0x50]]  ;;  %v1232_v17 = vmul.f32 %v2729_v4, %v1231_v6 }
 0x112   : > { %v1003_v48 = vadd.f32 %v1002_v39, %v980_v34  ;;  %v1092_v49 = vrot.slane %v1091_v47, 1  ;;  %1701 = vrot.lane.b32.xlu0 %v2425_v19, %s2251_s24  ;;  %v1016_v34 = vmul.f32 %v2674_v1, %v1015_v24  ;;  %v1154_v39 = vmul.f32 %v2729_v4, %v1153_v30  ;;  %s2832_s22 = sld [smem:[#allocation3 + $0x12]] }
 0x113   : > { %v1042_v50 = vsel %vm1041_vm6, %v1039_v42, %v1040_v44  ;;  %v1054_v51 = vadd.f32 %v1053_v46, %v1012_v38  ;;  %v1184_v38 = vstv %s2733_s15  ;;  %v1025_v46 = vstv %s2744_s18  ;;  %s2799_s15 = sld [smem:[#allocation3 + $0x4]] }
 0x114   : > { %v1044_v53 = vmul.f32 %v1042_v50, %v1037_v41  ;;  %v1081_v56 = vpop.permute.xlu1 %1080  ;;  %v1093_v58 = vsel %vm1083_vm7, %v1091_v47, %v1092_v49  ;;  %1711 = vrot.lane.b32.xlu1 %v2429_v0, %s2251_s24  ;;  %v1185_v47 = vmul.f32 %v2729_v4, %v1184_v38  ;;  %v1057_v50 = vstv %s2747_s19  ;;  %s2768_s24 = sld [smem:[#allocation3 + $0x25]] }
 0x115   : > { %v1082_v59 = vrot.slane %v1081_v56, 1  ;;  %v1095_v60 = vmul.f32 %v1093_v58, %v1089_v40  ;;  %v1133_v62 = vpop.permute.xlu0 %1132  ;;  %v1067_v11 = vstv %s2764_s23  ;;  %s2836_s23 = sld [smem:[#allocation3 + $0x49]]  ;;  %vm1322_vm6 = vcmask 252928  }
 0x116   : > { %v1045_v2 = vadd.f32 %v1044_v53, %v1003_v48  ;;  %v1134_v3 = vrot.slane %v1133_v62, 1  ;;  %1722 = vrot.lane.b32.xlu0 %v2425_v19, %s2252_s14  ;;  %s2874_s18 = sld [smem:[#allocation3 + $0x4a]] }
 0x117   : > { %v1084_v7 = vsel %vm1083_vm7, %v1081_v56, %v1082_v59  ;;  %v1096_v10 = vadd.f32 %v1095_v60, %v1054_v51  ;;  %v1026_v56 = vmul.f32 %v2674_v1, %v1025_v46  ;;  %v1194_v60 = vstv %s2754_s21  ;;  %s2827_s21 = sld [smem:[#allocation3 + $0x43]] }
 0x118   : > { %v1086_v12 = vmul.f32 %v1084_v7, %v1079_v55  ;;  %v1123_v13 = vpop.permute.xlu1 %1122  ;;  %v1135_v15 = vsel %vm1125_vm8, %v1133_v62, %v1134_v3  ;;  %1732 = vrot.lane.b32.xlu1 %v2429_v0, %s2252_s14  ;;  %v1241_v30 = vstv %s2776_s25  ;;  %s2796_s14 = sld [smem:[#allocation3 + $0x5e]]  ;;  %vm1427_vm7 = vcmask 646144  }
 0x119   : > { %v1124_v19 = vrot.slane %v1123_v13, 1  ;;  %v1137_v20 = vmul.f32 %v1135_v15, %v1131_v61  ;;  %v1146_v22 = vpop.permute.xlu0 %1145  ;;  %s2843_s25 = sld [smem:[#allocation3 + $0x18]] }
 0x11a   : > { %v1087_v23 = vadd.f32 %v1086_v12, %v1045_v2  ;;  %v1147_v9 = vrot.slane %v1146_v22, 1  ;;  %s2876_s19 = sld [smem:[#allocation3 + $0x19]] }
 0x11b   : > { %v1126_v0 = vsel %vm1125_vm8, %v1123_v13, %v1124_v19  ;;  %v1138_v25 = vadd.f32 %v1137_v20, %v1096_v10  ;;  %v1195_v10 = vmul.f32 %v2729_v4, %v1194_v60  ;;  %vm1364_vm8 = vcmask 1039360  }
 0x11c   : > { %v1128_v26 = vmul.f32 %v1126_v0, %v1121_v8  ;;  %v963_v29 = vpop.permute.xlu1 %962  ;;  %v1149_v31 = vsel %vm1148_vm9, %v1146_v22, %v1147_v9 }
 0x11d   : > { %v964_v32 = vrot.slane %v963_v29, 1  ;;  %v1151_v33 = vmul.f32 %v1149_v31, %v1144_v21  ;;  %v1018_v35 = vpop.permute.xlu0 %1017 }
 0x11e   : > { %v1129_v36 = vadd.f32 %v1128_v26, %v1087_v23  ;;  %v1019_v37 = vrot.slane %v1018_v35, 1  ;;  %v1099_v23 = vstv %s2768_s24  ;;  %s2841_s24 = sld [smem:[#allocation3 + $0x57]] }
 0x11f   : > { %v965_v18 = vsel %vm955_vm2, %v963_v29, %v964_v32  ;;  %v1100_v32 = vmul.f32 %v2674_v1, %v1099_v23  ;;  %vm1301_vm2 = vcmask 384000  }
 0x120   : > { %v967_v41 = vmul.f32 %v965_v18, %v961_v28  ;;  %v1156_v42 = vpop.permute.xlu1 %1155  ;;  %v1152_v43 = vadd.f32 %v1151_v33, %v1129_v36  ;;  %v1021_v44 = vsel %vm1020_vm11, %v1018_v35, %v1019_v37  ;;  %v1273_v36 = vstv %s2779_s30  ;;  %s2848_s30 = sld [smem:[#allocation3 + $0x26]] }
 0x121   : > { %v1157_v45 = vrot.slane %v1156_v42, 1  ;;  %v1023_v40 = vmul.f32 %v1021_v44, %v1016_v34  ;;  %v1187_v48 = vpop.permute.xlu0 %1186  ;;  %v1109_v44 = vstv %s2786_s9  ;;  %v1274_v46 = vmul.f32 %v2729_v4, %v1273_v36  ;;  %s2851_s9 = sld [smem:[#allocation3 + $0x51]] }
 0x122   : > { %v968_v49 = vadd.f32 %v967_v41, %v2669_v63  ;;  %v1188_v54 = vrot.slane %v1187_v48, 1  ;;  %v1058_v63 = vmul.f32 %v2674_v1, %v1057_v50 }
 0x123   : > { %v1158_v51 = vsel %vm1148_vm9, %v1156_v42, %v1157_v45  ;;  %v1024_v53 = vadd.f32 %v1023_v40, %v2681_v5  ;;  %vm1450_vm9 = vcmask 375808  }
 0x124   : > { %v1160_v55 = vmul.f32 %v1158_v51, %v1154_v39  ;;  %v1028_v57 = vpop.permute.xlu1 %1027  ;;  %v1190_v58 = vsel %vm1189_vm12, %v1187_v48, %v1188_v54  ;;  %v1242_v39 = vmul.f32 %v2729_v4, %v1241_v30 }
 0x125   : > { %v1029_v59 = vrot.slane %v1028_v57, 1  ;;  %v1192_v61 = vmul.f32 %v1190_v58, %v1185_v47  ;;  %v1060_v62 = vpop.permute.xlu0 %1059  ;;  %v1283_v58 = vstv %s2796_s14  ;;  %s2859_s14 = sld [smem:[#allocation3 + $0x3c]] }
 0x126   : > { %v1161_v2 = vadd.f32 %v1160_v55, %v1138_v25  ;;  %v1061_v3 = vrot.slane %v1060_v62, 1  ;;  %v1068_v25 = vmul.f32 %v2674_v1, %v1067_v11 }
 0x127   : > { %v1030_v5 = vsel %vm1020_vm11, %v1028_v57, %v1029_v59  ;;  %v1193_v7 = vadd.f32 %v1192_v61, %v1152_v43  ;;  %vm1492_vm11 = vcmask 113664  }
 0x128   : > { %v1032_v8 = vmul.f32 %v1030_v5, %v1026_v56  ;;  %v1197_v12 = vpop.permute.xlu1 %1196  ;;  %v1063_v13 = vsel %vm1062_vm13, %v1060_v62, %v1061_v3 }
 0x129   : > { %v1198_v15 = vrot.slane %v1197_v12, 1  ;;  %v1065_v19 = vmul.f32 %v1063_v13, %v1058_v63  ;;  %v1234_v20 = vpop.permute.xlu0 %1233  ;;  %v1173_v13 = vstv %s2806_s16  ;;  %s2866_s16 = sld [smem:[#allocation3 + $0x5f]] }
 0x12a   : > { %v1033_v21 = vadd.f32 %v1032_v8, %v968_v49  ;;  %v1235_v22 = vrot.slane %v1234_v20, 1  ;;  %v1164_v49 = vstv %s2789_s10  ;;  %s2855_s10 = sld [smem:[#allocation3 + $0x20]] }
 0x12b   : > { %v1199_v9 = vsel %vm1189_vm12, %v1197_v12, %v1198_v15  ;;  %v1066_v24 = vadd.f32 %v1065_v19, %v1024_v53  ;;  %v1110_v53 = vmul.f32 %v2674_v1, %v1109_v44  ;;  %v1165_v60 = vmul.f32 %v2729_v4, %v1164_v49 }
 0x12c   : > { %v1201_v0 = vmul.f32 %v1199_v9, %v1195_v10  ;;  %v1070_v26 = vpop.permute.xlu1 %1069  ;;  %v1237_v28 = vsel %vm1236_vm14, %v1234_v20, %v1235_v22  ;;  %v1296_v1 = vstv %s2799_s15  ;;  %v1174_v9 = vmul.f32 %v2729_v4, %v1173_v13  ;;  %s2862_s15 = sld [smem:[#allocation3 + $0xb]] }
 0x12d   : > { %v1071_v29 = vrot.slane %v1070_v26, 1  ;;  %v1239_v31 = vmul.f32 %v1237_v28, %v1232_v17  ;;  %v1102_v33 = vpop.permute.xlu0 %1101  ;;  %v1205_v49 = vstv %s2843_s25  ;;  %s2952_s25 = sld [smem:[#allocation3 + $0x28]]  ;;  %vm1471_vm12 = vcmask 244736  }
 0x12e   : > { %v1202_v34 = vadd.f32 %v1201_v0, %v1161_v2  ;;  %v1103_v35 = vrot.slane %v1102_v33, 1  ;;  %v2819_v2 = vld [vmem:[%s3358_s3 + $0x4] ss:$8 sm:$0x3] }
 0x12f   : > { %v1072_v37 = vsel %vm1062_vm13, %v1070_v26, %v1071_v29  ;;  %v1240_v38 = vadd.f32 %v1239_v31, %v1193_v7  ;;  %v1284_v7 = vmul.f32 %v2729_v4, %v1283_v58  ;;  %v1297_v11 = vmul.f32 %v2819_v2, %v1296_v1 }
 0x130   : > { %v1074_v18 = vmul.f32 %v1072_v37, %v1068_v25  ;;  %v1244_v41 = vpop.permute.xlu1 %1243  ;;  %v1105_v42 = vsel %vm1104_vm15, %v1102_v33, %v1103_v35  ;;  %v1306_v26 = vstv %s2814_s17  ;;  %s2870_s17 = sld [smem:[#allocation3 + $0x2e]]  ;;  %v1213_v58 = vrot.slane %v2411_v14, %v2377_v52 }
 0x131   : > { %v1245_v43 = vrot.slane %v1244_v41, 1  ;;  %v1107_v45 = vmul.f32 %v1105_v42, %v1100_v32  ;;  %v1276_v40 = vpop.permute.xlu0 %1275  ;;  %v1327_v1 = vstv %s2859_s14  ;;  %vm1534_vm13 = vcmask 900096   ;;  %s3414_s14 = sld [smem:[#allocation31_spill]] }
 0x132   : > { %v1075_v47 = vadd.f32 %v1074_v18, %v1033_v21  ;;  %v1277_v48 = vrot.slane %v1276_v40, 1 }
 0x133   : > { %v1246_v54 = vsel %vm1236_vm14, %v1244_v41, %v1245_v43  ;;  %v1108_v50 = vadd.f32 %v1107_v45, %v1066_v24  ;;  %vm1513_vm14 = vcmask 1031168  }
 0x134   : > { %v1248_v51 = vmul.f32 %v1246_v54, %v1242_v39  ;;  %v1112_v55 = vpop.permute.xlu1 %1111  ;;  %v1279_v56 = vsel %vm1278_vm1, %v1276_v40, %v1277_v48 }
 0x135   : > { %v1113_v57 = vrot.slane %v1112_v55, 1  ;;  %v1281_v59 = vmul.f32 %v1279_v56, %v1274_v46  ;;  %v1167_v61 = vpop.permute.xlu0 %1166  ;;  %v1262_v56 = vstv %s2841_s24  ;;  %s2941_s24 = sld [smem:[#allocation3 + $0x59]] }
 0x136   : > { %v1249_v63 = vadd.f32 %v1248_v51, %v1202_v34  ;;  %v1168_v62 = vrot.slane %v1167_v61, 1  ;;  %v1307_v34 = vmul.f32 %v2819_v2, %v1306_v26  ;;  %v1411_v26 = vstv %s2886_s2  ;;  %s3046_s2 = sld [smem:[#allocation3 + $0x4c]] }
 0x137   : > { %v1114_v3 = vsel %vm1104_vm15, %v1112_v55, %v1113_v57  ;;  %v1282_v6 = vadd.f32 %v1281_v59, %v1240_v38  ;;  %v1338_v55 = vstv %s2832_s22  ;;  %v1206_v57 = vmul.f32 %v2729_v4, %v1205_v49  ;;  %s2935_s22 = sld [smem:[#allocation3 + $0x2f]] }
 0x138   : > { %v1116_v5 = vmul.f32 %v1114_v3, %v1110_v53  ;;  %v1286_v8 = vpop.permute.xlu1 %1285  ;;  %v1169_v10 = vsel %vm401_vm5, %v1167_v61, %v1168_v62  ;;  %v1225_v53 = vrot.slane %v2417_v16, %v2377_v52  ;;  %v1252_v61 = vstv %s2848_s30  ;;  %s2963_s30 = sld [smem:[#allocation3 + $0x37]] }
 0x139   : > { %v1287_v12 = vrot.slane %v1286_v8, 1  ;;  %v1171_v15 = vmul.f32 %v1169_v10, %v1165_v60  ;;  %v1299_v19 = vpop.permute.xlu0 %1298  ;;  %v1380_v62 = vstv %s2855_s10  ;;  %v1317_v3 = vstv %s2862_s15  ;;  %s2992_s15 = sld [smem:[#allocation3 + $0x3e]] }
 0x13a   : > { %v1117_v17 = vadd.f32 %v1116_v5, %v1075_v47  ;;  %v1300_v20 = vrot.slane %v1299_v19, 1  ;;  %v1217_v47 = vstv %s2836_s23  ;;  %s2918_s23 = sld [smem:[#allocation3 + $0x1a]]  ;;  %v2944_v52 = vmul.f32 %v2819_v2, %v1338_v55 }
 0x13b   : > { %v1288_v21 = vsel %vm1278_vm1, %v1286_v8, %v1287_v12  ;;  %v2830_v22 = vadd.f32 %v1171_v15, %v1108_v50  ;;  %v1348_v50 = vstv %s2827_s21  ;;  %v1218_v51 = vmul.f32 %v2729_v4, %v1217_v47  ;;  %s2927_s21 = sld [smem:[#allocation3 + $0x60]] }
 0x13c   : > { %v1290_v23 = vmul.f32 %v1288_v21, %v1284_v7  ;;  %v1176_v24 = vpop.permute.xlu1 %1175  ;;  %v1302_v0 = vsel %vm1301_vm2, %v1299_v19, %v1300_v20  ;;  %v2930_v60 = vmul.f32 %v2819_v2, %v1348_v50  ;;  %v1432_v5 = vstv %s2866_s16  ;;  %s3002_s16 = sld [smem:[#allocation3 + $0xd]] }
 0x13d   : > { %v1177_v25 = vrot.slane %v1176_v24, 1  ;;  %v1304_v28 = vmul.f32 %v1302_v0, %v1297_v11  ;;  %v2839_v29 = vpop.permute.xlu0 %1340  ;;  %v2946_v14 = vmul.f32 %v1225_v53, %v1218_v51  ;;  %v2954_v7 = vmul.f32 %v1213_v58, %v1206_v57 }
 0x13e   : > { %v1291_v30 = vadd.f32 %v1290_v23, %v1249_v63  ;;  %v1390_v63 = vstv %s2851_s9  ;;  %v2957_v8 = vmul.f32 %v2729_v4, %v1252_v61  ;;  %v1422_v10 = vstv %s2870_s17  ;;  %s2979_s9 = sld [smem:[#allocation3 + $0x6]]  ;;  %v2988_v23 = vld [vmem:[%s3358_s3 + $0x5] ss:$8 sm:$0x3] }
 0x13f   : > { %v1178_v31 = vsel %vm401_vm5, %v1176_v24, %v1177_v25  ;;  %v2846_v32 = vadd.f32 %v1304_v28, %v1282_v6  ;;  %v2949_v6 = vmul.f32 %v2729_v4, %v1262_v56  ;;  %v1369_v12 = vstv %s2874_s18  ;;  %s3288_s17 = sld [smem:[#allocation3 + $0x61]] }
 0x140   : > { %v1180_v33 = vmul.f32 %v1178_v31, %v1174_v9  ;;  %v1309_v35 = vpop.permute.xlu1 %1308  ;;  %vm1343_vm5 = vcmask 121856   ;;  %v2966_v15 = vmul.f32 %v2819_v2, %v1390_v63  ;;  %v2969_v11 = vmul.f32 %v2819_v2, %v1380_v62  ;;  %s1742_s18 = sld [smem:[#allocation2]] }
 0x141   : > { %v1310_v36 = vrot.slane %v1309_v35, 1  ;;  %v2853_v37 = vpop.permute.xlu0 %1254  ;;  %v2972_v19 = vmul.f32 %v2819_v2, %v1327_v1  ;;  %v2975_v4 = vmul.f32 %v2819_v2, %v1317_v3  ;;  %v2982_v20 = vmul.f32 %v2819_v2, %v1432_v5 }
 0x142   : > { %v2857_v38 = vadd.f32 %v1180_v33, %v1117_v17  ;;  %v1359_v21 = vstv %s2876_s19  ;;  %v1455_v9 = vstv %s2880_s0  ;;  %v1445_v24 = vstv %s2884_s1  ;;  %s3022_s0 = sld [smem:[#allocation3 + $0x45]]  ;;  %s1875_s19 = sshll.u32 %s2367_s20, 1 }
 0x143   : > { %v1311_v18 = vsel %vm1301_vm2, %v1309_v35, %v1310_v36  ;;  %v2995_v0 = vmul.f32 %v2819_v2, %v1422_v10  ;;  %v2998_v25 = vmul.f32 %v2819_v2, %v1369_v12  ;;  %v1401_v28 = vstv %s2888_s4  ;;  %s3032_s1 = sld [smem:[#allocation3 + $0x14]]  ;;  %s1984_s20 = sshll.u32 %s2318_s5, 4 }
 0x144   : > { %v1313_v39 = vmul.f32 %v1311_v18, %v1307_v34  ;;  %v2864_v41 = vpop.permute.xlu1 %1350  ;;  %v1497_v31 = vstv %s2892_s11  ;;  %v1487_v33 = vstv %s2896_s28  ;;  %v1476_v34 = vstv %s2898_s8  ;;  %s3056_s4 = sld [smem:[#allocation3 + $0x1b]] }
 0x145   : > { %v2868_v42 = vpop.permute.xlu0 %1382  ;;  %v1466_v35 = vstv %s2900_s13  ;;  %v3011_v36 = vmul.f32 %v2819_v2, %v1359_v21  ;;  %v3014_v18 = vmul.f32 %v2988_v23, %v1455_v9  ;;  %v1539_v49 = vstv %s2905_s26  ;;  %s3256_s8 = sld [smem:[#allocation3 + $0x30]] }
 0x146   : > { %v2872_v43 = vadd.f32 %v1313_v39, %v1291_v30  ;;  %v3017_v39 = vmul.f32 %v2988_v23, %v1445_v24  ;;  %v3025_v50 = vmul.f32 %v2819_v2, %v1411_v26  ;;  %v3028_v51 = vmul.f32 %v2819_v2, %v1401_v28  ;;  %v3075_v28 = vld [vmem:[%s3358_s3 + $0x6] ss:$8 sm:$0x3]  ;;  %s3264_s11 = sld [smem:[#allocation3 + $0x53]] }
 0x147   : > { %v1529_v53 = vstv %s2910_s29  ;;  %v1518_v55 = vstv %s2913_s6  ;;  %v3035_v56 = vmul.f32 %v2988_v23, %v1497_v31  ;;  %v3038_v57 = vmul.f32 %v2988_v23, %v1487_v33  ;;  %s3068_s6 = sld [smem:[#allocation3 + $0x22]] }
 0x148   : > { %v2878_v44 = vpop.permute.xlu1 %1264  ;;  %v3041_v58 = vmul.f32 %v2988_v23, %v1476_v34  ;;  %v3044_v61 = vmul.f32 %v2988_v23, %v1466_v35  ;;  %v1342_v2 = vrot.slane %v2839_v29, 1  ;;  %v3052_v62 = vmul.f32 %v2988_v23, %v1539_v49  ;;  %s3119_s29 = sld [smem:[#allocation3 + $0x29]] }
 0x149   : > { %v2882_v45 = vpop.permute.xlu0 %1319  ;;  %v1508_v1 = vstv %s2918_s23  ;;  %v1581_v3 = vstv %s2927_s21  ;;  %v3061_v10 = vmul.f32 %v2988_v23, %v1529_v53  ;;  %v3064_v12 = vmul.f32 %v2988_v23, %v1518_v55  ;;  %s3269_s13 = sld [smem:[#allocation3 + $0x5a]] }
 0x14a   : > { %3389 = vst [vmem:[#allocation15_spill] sm:$0xff] %v3041_v58  ;;  %3390 = vst [vmem:[#allocation16_spill] sm:$0xff] %v3052_v62  ;;  %v1571_v21 = vstv %s2935_s22  ;;  %v1560_v9 = vstv %s2941_s24  ;;  %v1256_v24 = vrot.slane %v2853_v37, 1  ;;  %v1550_v26 = vstv %s2952_s25  ;;  %s301_s22 = scalar_lea.vmem %s3362_s7, %s1875_s19  ;;  %s285_s24 = sand.u32 1, %s2191_s27  }
 0x14b   : > { %3391 = vst [vmem:[#allocation17_spill] sm:$0xff] %v3064_v12  ;;  %v1604_v31 = vstv %s2963_s30  ;;  %v1594_v33 = vstv %s2979_s9  ;;  %v3080_v34 = vmul.f32 %v2988_v23, %v1508_v1  ;;  %v3083_v35 = vmul.f32 %v2988_v23, %v1581_v3  ;;  %s286_s25 = scalar_lea.vmem [#allocation6], %s285_s24 }
 0x14c   : > { %v2890_v46 = vpop.permute.xlu1 %1392  ;;  %v1625_v49 = vstv %s2992_s15  ;;  %v1615_v53 = vstv %s3002_s16  ;;  %v1344_v55 = vsel %vm1343_vm5, %v2839_v29, %v1342_v2  ;;  %v1384_v27 = vrot.slane %v2868_v42, 1  ;;  %s1773_s30 = sshll.u32 %s286_s25, 4  ;;  %s3320_s15 = scalar_lea.hbm %s3414_s14, %s1984_s20  ;;  %s1774_s30 = int_to_ptr.vmem [resolvable:$true] %s1773_s30 }
 0x14d   : > { %v2894_v40 = vpop.permute.xlu0 %1424  ;;  %3392 = vst [vmem:[#allocation18_spill] sm:$0xff] %v3083_v35  ;;  %v3093_v62 = vmul.f32 %v2988_v23, %v1571_v21  ;;  %v3096_v58 = vmul.f32 %v2988_v23, %v1560_v9  ;;  %v3101_v3 = vmul.f32 %v2988_v23, %v1550_v26  ;;  %v3104_v29 = vmul.f32 %v3075_v28, %v1604_v31  ;;  %s1757_s16 = scalar_lea.sflag [#allocation4], %s285_s24 }
 0x14e   : > { %v3107_v2 = vmul.f32 %v3075_v28, %v1594_v33  ;;  %v1646_v21 = vstv %s3022_s0  ;;  %v1258_v35 = vsel %vm1257_vm3, %v2853_v37, %v1256_v24  ;;  %v1321_v9 = vrot.slane %v2882_v45, 1  ;;  %s2135_s0 = scalar_lea.vmem %s1774_s30, 16 }
 0x14f   : > { %3393 = vst [vmem:[#allocation19_spill] sm:$0xff] %v3093_v62  ;;  %3394 = vst [vmem:[#allocation20_spill] sm:$0xff] %v3096_v58  ;;  %v3114_v58 = vmul.f32 %v3075_v28, %v1625_v49  ;;  %v3117_v62 = vmul.f32 %v3075_v28, %v1615_v53  ;;  %v1352_v23 = vrot.slane %v2864_v41, 1  ;;  %v1346_v26 = vmul.f32 %v1344_v55, %v2944_v52  ;;  %p2136_p9 = scmp.ne.s32.totalorder %s1774_s30, %s2135_s0 }
 0x150   : > { %v2903_v48 = vpop.permute.xlu1 %1329  ;;  %3395 = vst [vmem:[#allocation21_spill] sm:$0xff] %v3104_v29  ;;  %3396 = vst [vmem:[#allocation22_spill] sm:$0xff] %v3107_v2  ;;  %v1636_v31 = vstv %s3032_s1  ;;  %v1667_v33 = vstv %s3046_s2  ;;  %v1386_v37 = vsel %vm1385_vm4, %v2868_v42, %v1384_v27  ;;  %v1426_v24 = vrot.slane %v2894_v40, 1  ;;  %s2253_s1 = smov [#allocation6]  }
 0x151   : > { %v2908_v54 = vpop.permute.xlu0 %1361  ;;  %3397 = vst [vmem:[#allocation23_spill] sm:$0xff] %v3114_v58  ;;  %3398 = vst [vmem:[#allocation24_spill] sm:$0xff] %v3117_v62  ;;  %v3131_v53 = vmul.f32 %v3075_v28, %v1646_v21  ;;  %v1657_v58 = vstv %s3056_s4  ;;  %v1266_v29 = vrot.slane %v2878_v44, 1  ;;  %v1216_v62 = vadd.f32 %v2954_v7, %v2830_v22  ;;  %p2137_p10 = pnand %p2136_p9, %p2335_p5  ;;  %s2139_s2 = sshll.u32 %s2253_s1, 4  ;;  %s2140_s2 = int_to_ptr.vmem [resolvable:$false] %s2139_s2 }
 0x152   : > { %v1260_v52 = vmul.f32 %v1258_v35, %v2957_v8  ;;  %v1678_v2 = vstv %s3068_s6  ;;  %v1323_v27 = vsel %vm1322_vm6, %v2882_v45, %v1321_v9  ;;  %v1363_v42 = vrot.slane %v2908_v54, 1  ;;  %s2141_s5 = scalar_lea.vmem %s2140_s2, 32  ;;  %p2142_p13 = scmp.lt.s32.totalorder %s1774_s30, %s2140_s2 }
 0x153   : > { %3399 = vst [vmem:[#allocation25_spill] sm:$0xff] %v3131_v53  ;;  %v3145_v21 = vmul.f32 %v3075_v28, %v1636_v31  ;;  %v3148_v53 = vmul.f32 %v3075_v28, %v1667_v33  ;;  %v1353_v22 = vsel %vm1343_vm5, %v2864_v41, %v1352_v23  ;;  %v1347_v7 = vadd.f32 %v1346_v26, %v2846_v32  ;;  %p2138_p12 = pneg %p2137_p10  ;;  %p2143_p0 = scmp.lt.s32.totalorder %s2141_s5, %s2135_s0 }
 0x154   : > { %v2925_v59 = vpop.permute.xlu1 %1434  ;;  %v1394_v8 = vrot.slane %v2890_v46, 1  ;;  %v1388_v35 = vmul.f32 %v1386_v37, %v2969_v11  ;;  %v1428_v45 = vsel %vm1427_vm7, %v2894_v40, %v1426_v24  ;;  %v3161_v33 = vmul.f32 %v3075_v28, %v1657_v58 }
 0x155   : > { %v2933_v16 = vpop.permute.xlu0 %1447  ;;  %3400 = vst [vmem:[#allocation26_spill] sm:$0xff] %v3148_v53  ;;  %v3164_v41 = vmul.f32 %v3075_v28, %v1678_v2  ;;  %v1267_v32 = vsel %vm1257_vm3, %v2878_v44, %v1266_v29  ;;  %v1261_v23 = vadd.f32 %v1260_v52, %v1216_v62  ;;  %v1331_v11 = vrot.slane %v2903_v48, 1  ;;  %p2144_p1 = por %p2143_p0, %p2142_p13 }
 0x156   : > { %v1449_v9 = vrot.slane %v2933_v16, 1  ;;  %v1325_v26 = vmul.f32 %v1323_v27, %v2975_v4  ;;  %v1355_v37 = vmul.f32 %v1353_v22, %v2930_v60  ;;  %v1365_v58 = vsel %vm1364_vm8, %v2908_v54, %v1363_v42 }
 0x157   : > { %v1699_v2 = vstv %s3119_s29  ;;  %v1395_v53 = vsel %vm1385_vm4, %v2890_v46, %v1394_v8  ;;  %v1389_v44 = vadd.f32 %v1388_v35, %v1347_v7  ;;  %v1436_v62 = vrot.slane %v2925_v59, 1  ;;  %p2145_p2 = pnand %p2144_p1, %p2138_p12 }
 0x158   : > { %v2961_v13 = vpop.permute.xlu1 %1371  ;;  %v1430_v29 = vmul.f32 %v1428_v45, %v2995_v0  ;;  %v1228_v4 = vadd.f32 %v2946_v14, %v2857_v38  ;;  %v1269_v60 = vmul.f32 %v1267_v32, %v2949_v6  ;;  %v1451_v54 = vsel %vm1450_vm9, %v2933_v16, %v1449_v9 }
 0x159   : > { %v2977_v17 = vpop.permute.xlu0 %1403  ;;  %v1332_v46 = vsel %vm1322_vm6, %v2903_v48, %v1331_v11  ;;  %v1326_v42 = vadd.f32 %v1325_v26, %v1261_v23  ;;  %v1373_v22 = vrot.slane %v2961_v13, 1  ;;  %v1367_v0 = vmul.f32 %v1365_v58, %v3011_v36 }
 0x15a   : > { %v1405_v24 = vrot.slane %v2977_v17, 1  ;;  %vm1576_vm15 = vcmask 637952   ;;  %v1356_v38 = vadd.f32 %v1355_v37, %v2872_v43  ;;  %v1397_v14 = vmul.f32 %v1395_v53, %v2966_v15 }
 0x15b   : > { %v1437_v48 = vsel %vm1427_vm7, %v2925_v59, %v1436_v62  ;;  %v1431_v8 = vadd.f32 %v1430_v29, %v1389_v44  ;;  %v1453_v36 = vmul.f32 %v1451_v54, %v3017_v39  ;;  %vm1555_vm1 = vcmask 769024  }
 0x15c   : > { %v3004_v30 = vpop.permute.xlu1 %1457  ;;  %v1407_v16 = vsel %vm1406_vm10, %v2977_v17, %v1405_v24  ;;  %v1270_v45 = vadd.f32 %v1269_v60, %v1228_v4  ;;  %v1334_v9 = vmul.f32 %v1332_v46, %v2972_v19  ;;  %v1374_v53 = vsel %vm1364_vm8, %v2961_v13, %v1373_v22 }
 0x15d   : > { %v3019_v47 = vpop.permute.xlu0 %1489  ;;  %v1459_v35 = vrot.slane %v3004_v30, 1  ;;  %v1368_v59 = vadd.f32 %v1367_v0, %v1326_v42  ;;  %v1409_v23 = vmul.f32 %v1407_v16, %v3028_v51  ;;  %vm1599_vm2 = vcmask 367616  }
 0x15e   : > { %v1491_v52 = vrot.slane %v3019_v47, 1  ;;  %v1398_v11 = vadd.f32 %v1397_v14, %v1356_v38  ;;  %v1439_v19 = vmul.f32 %v1437_v48, %v2982_v20  ;;  %v1454_v58 = vadd.f32 %v1453_v36, %v1431_v8 }
 0x15f   : > { %v1460_v37 = vsel %vm1450_vm9, %v3004_v30, %v1459_v35  ;;  %vm1620_vm5 = vcmask 236544   ;;  %v1335_v51 = vadd.f32 %v1334_v9, %v1270_v45  ;;  %v1376_v44 = vmul.f32 %v1374_v53, %v2998_v25  ;;  %v3401_v45 = vld [vmem:[#allocation19_spill] sm:$0xff] }
 0x160   : > { %v3049_v63 = vpop.permute.xlu1 %1413  ;;  %v1493_v43 = vsel %vm1492_vm11, %v3019_v47, %v1491_v52  ;;  %v1410_v30 = vadd.f32 %v1409_v23, %v1368_v59  ;;  %vm1641_vm3 = vcmask 105472   ;;  %v1440_v54 = vadd.f32 %v1439_v19, %v1398_v11 }
 0x161   : > { %v3058_v5 = vpop.permute.xlu0 %1468  ;;  %v1415_v32 = vrot.slane %v3049_v63, 1  ;;  %v1495_v24 = vmul.f32 %v1493_v43, %v3038_v57  ;;  %v1462_v25 = vmul.f32 %v1460_v37, %v3014_v18  ;;  %vm1662_vm4 = vcmask 1022976  }
 0x162   : > { %v1470_v6 = vrot.slane %v3058_v5, 1  ;;  %vm1683_vm6 = vcmask 891904   ;;  %vm1704_vm7 = vcmask 760832   ;;  %vm1725_vm8 = vcmask 629760  }
 0x163   : > { %v1416_v29 = vsel %vm1406_vm10, %v3049_v63, %v1415_v32  ;;  %v1496_v42 = vadd.f32 %v1495_v24, %v1454_v58  ;;  %v3404_v24 = vld [vmem:[#allocation22_spill] sm:$0xff] }
 0x164   : > { %v3090_v12 = vpop.permute.xlu1 %1499  ;;  %v1472_v47 = vsel %vm1471_vm12, %v3058_v5, %v1470_v6  ;;  %v1418_v0 = vmul.f32 %v1416_v29, %v3025_v50 }
 0x165   : > { %v3098_v1 = vpop.permute.xlu0 %1531  ;;  %v1501_v13 = vrot.slane %v3090_v12, 1  ;;  %v1474_v60 = vmul.f32 %v1472_v47, %v3044_v61  ;;  %v1377_v61 = vadd.f32 %v1376_v44, %v1335_v51  ;;  %v3403_v47 = vld [vmem:[#allocation16_spill] sm:$0xff]  ;;  %v3405_v44 = vld [vmem:[#allocation17_spill] sm:$0xff] }
 0x166   : > { %v1533_v15 = vrot.slane %v3098_v1, 1 }
 0x167   : > { %v1502_v46 = vsel %vm1492_vm11, %v3090_v12, %v1501_v13  ;;  %v1475_v16 = vadd.f32 %v1474_v60, %v1410_v30  ;;  %v1419_v43 = vadd.f32 %v1418_v0, %v1377_v61  ;;  %v1700_v30 = vmul.f32 %v3075_v28, %v1699_v2 }
 0x168   : > { %v3128_v49 = vpop.permute.xlu1 %1478  ;;  %v1535_v20 = vsel %vm1534_vm13, %v3098_v1, %v1533_v15  ;;  %v1504_v8 = vmul.f32 %v1502_v46, %v3035_v56  ;;  %v3402_v15 = vld [vmem:[#allocation15_spill] sm:$0xff] }
 0x169   : > { %v3138_v55 = vpop.permute.xlu0 %1510  ;;  %v1480_v4 = vrot.slane %v3128_v49, 1  ;;  %v1537_v22 = vmul.f32 %v1535_v20, %v3061_v10  ;;  %v1463_v10 = vadd.f32 %v1462_v25, %v1440_v54 }
 0x16a   : > { %v1512_v26 = vrot.slane %v3138_v55, 1 }
 0x16b   : > { %v1538_v36 = vadd.f32 %v1537_v22, %v1496_v42  ;;  %v1505_v19 = vadd.f32 %v1504_v8, %v1463_v10 }
 0x16c   : > { %v3158_v31 = vpop.permute.xlu1 %1541  ;;  %v1514_v1 = vsel %vm1513_vm14, %v3138_v55, %v1512_v26  ;;  %v1481_v55 = vsel %vm1471_vm12, %v3128_v49, %v1480_v4 }
 0x16d   : > { %v3170_v40 = vpop.permute.xlu0 %1573  ;;  %v1543_v63 = vrot.slane %v3158_v31, 1  ;;  %v1516_v6 = vmul.f32 %v1514_v1, %v3080_v34  ;;  %v1483_v34 = vmul.f32 %v1481_v55, %v3402_v15 }
 0x16e   : > { %v1575_v62 = vrot.slane %v3170_v40, 1 }
 0x170   : > { %v3187_v27 = vpop.permute.xlu1 %1520  ;;  %v1577_v18 = vsel %vm1576_vm15, %v3170_v40, %v1575_v62  ;;  %v1544_v40 = vsel %vm1534_vm13, %v3158_v31, %v1543_v63 }
 0x171   : > { %v3193_v7 = vpop.permute.xlu0 %1552  ;;  %v1522_v12 = vrot.slane %v3187_v27, 1  ;;  %v1579_v9 = vmul.f32 %v1577_v18, %v3401_v45  ;;  %v1546_v26 = vmul.f32 %v1544_v40, %v3403_v47  ;;  %v3408_v18 = vld [vmem:[#allocation20_spill] sm:$0xff]  ;;  %v1688_v40 = vstv %s3264_s11  ;;  %v3411_v47 = vld [vmem:[#allocation25_spill] sm:$0xff] }
 0x172   : > { %v1554_v52 = vrot.slane %v3193_v7, 1 }
 0x173   : > { %v1523_v56 = vsel %vm1513_vm14, %v3187_v27, %v1522_v12  ;;  %v1580_v27 = vadd.f32 %v1579_v9, %v1538_v36  ;;  %v1547_v1 = vadd.f32 %v1546_v26, %v1505_v19  ;;  %v1720_v12 = vstv %s3256_s8 }
 0x174   : > { %v3208_v17 = vpop.permute.xlu1 %1583  ;;  %v1556_v50 = vsel %vm1555_vm1, %v3193_v7, %v1554_v52  ;;  %v1517_v7 = vadd.f32 %v1516_v6, %v1475_v16  ;;  %v1525_v20 = vmul.f32 %v1523_v56, %v3405_v44  ;;  %v3407_v52 = vld [vmem:[#allocation18_spill] sm:$0xff] }
 0x175   : > { %v1597_v39 = vpop.permute.xlu0 %1596  ;;  %v1585_v49 = vrot.slane %v3208_v17, 1  ;;  %v1558_v23 = vmul.f32 %v1556_v50, %v3101_v3  ;;  %v1484_v3 = vadd.f32 %v1483_v34, %v1419_v43  ;;  %v1709_v43 = vstv %s3269_s13  ;;  %v3410_v34 = vld [vmem:[#allocation23_spill] sm:$0xff] }
 0x176   : > { %v1598_v14 = vrot.slane %v1597_v39, 1 }
 0x177   : > { %v1586_v58 = vsel %vm1576_vm15, %v3208_v17, %v1585_v49  ;;  %v1559_v60 = vadd.f32 %v1558_v23, %v1517_v7  ;;  %v1526_v0 = vadd.f32 %v1525_v20, %v1484_v3 }
 0x178   : > { %v3226_v5 = vpop.permute.xlu1 %1562  ;;  %v1600_v53 = vsel %vm1599_vm2, %v1597_v39, %v1598_v14  ;;  %v1588_v46 = vmul.f32 %v1586_v58, %v3407_v52 }
 0x179   : > { %v1618_v57 = vpop.permute.xlu0 %1617  ;;  %v1564_v31 = vrot.slane %v3226_v5, 1  ;;  %v1602_v51 = vmul.f32 %v1600_v53, %v3404_v24 }
 0x17a   : > { %v1619_v35 = vrot.slane %v1618_v57, 1  ;;  %v1589_v50 = vadd.f32 %v1588_v46, %v1547_v1 }
 0x17b   : > { %v1565_v4 = vsel %vm1555_vm1, %v3226_v5, %v1564_v31  ;;  %v1603_v61 = vadd.f32 %v1602_v51, %v1580_v27  ;;  %v1710_v51 = vmul.f32 %v3075_v28, %v1709_v43 }
 0x17c   : > { %v1607_v38 = vpop.permute.xlu1 %1606  ;;  %v1621_v39 = vsel %vm1620_vm5, %v1618_v57, %v1619_v35  ;;  %v3406_v57 = vld [vmem:[#allocation24_spill] sm:$0xff]  ;;  %v1567_v14 = vmul.f32 %v1565_v4, %v3408_v18  ;;  %v3409_v35 = vld [vmem:[#allocation21_spill] sm:$0xff] }
 0x17d   : > { %v1639_v48 = vpop.permute.xlu0 %1638  ;;  %v1608_v13 = vrot.slane %v1607_v38, 1  ;;  %v1623_v54 = vmul.f32 %v1621_v39, %v3406_v57 }
 0x17e   : > { %v1640_v32 = vrot.slane %v1639_v48, 1  ;;  %v1568_v15 = vadd.f32 %v1567_v14, %v1526_v0 }
 0x17f   : > { %v1609_v22 = vsel %vm1599_vm2, %v1607_v38, %v1608_v13  ;;  %v3412_v13 = vld [vmem:[#allocation26_spill] sm:$0xff] }
 0x180   : > { %v1628_v59 = vpop.permute.xlu1 %1627  ;;  %v1642_v29 = vsel %vm1641_vm3, %v1639_v48, %v1640_v32  ;;  %v1624_v48 = vadd.f32 %v1623_v54, %v1559_v60  ;;  %v1721_v32 = vmul.f32 %v3075_v28, %v1720_v12 }
 0x181   : > { %v1660_v11 = vpop.permute.xlu0 %1659  ;;  %v1629_v17 = vrot.slane %v1628_v59, 1  ;;  %v1644_v5 = vmul.f32 %v1642_v29, %v3145_v21  ;;  %v1611_v21 = vmul.f32 %v1609_v22, %v3409_v35  ;;  %v1730_v29 = vstv %s3288_s17 }
 0x182   : > { %v1661_v37 = vrot.slane %v1660_v11, 1  ;;  %v1731_v1 = vmul.f32 %v3075_v28, %v1730_v29 }
 0x183   : > { %v1630_v6 = vsel %vm1620_vm5, %v1628_v59, %v1629_v17  ;;  %v1645_v45 = vadd.f32 %v1644_v5, %v1603_v61  ;;  %v1612_v19 = vadd.f32 %v1611_v21, %v1589_v50 }
 0x184   : > { %v1649_v62 = vpop.permute.xlu1 %1648  ;;  %v1663_v42 = vsel %vm1662_vm4, %v1660_v11, %v1661_v37  ;;  %v1632_v53 = vmul.f32 %v1630_v6, %v3410_v34 }
 0x185   : > { %v1681_v25 = vpop.permute.xlu0 %1680  ;;  %v1650_v2 = vrot.slane %v1649_v62, 1  ;;  %v1665_v8 = vmul.f32 %v1663_v42, %v3161_v33 }
 0x186   : > { %v1682_v63 = vrot.slane %v1681_v25, 1  ;;  %v1633_v27 = vadd.f32 %v1632_v53, %v1568_v15 }
 0x187   : > { %v1651_v49 = vsel %vm1641_vm3, %v1649_v62, %v1650_v2  ;;  %v1666_v7 = vadd.f32 %v1665_v8, %v1624_v48  ;;  %v3413_v8 = vlaneseq }
 0x188   : > { %v1670_v55 = vpop.permute.xlu1 %1669  ;;  %v1684_v16 = vsel %vm1683_vm6, %v1681_v25, %v1682_v63  ;;  %v1653_v26 = vmul.f32 %v1651_v49, %v3411_v47 }
 0x189   : > { %v1671_v10 = vrot.slane %v1670_v55, 1  ;;  %v1702_v38 = vpop.permute.xlu0 %1701  ;;  %v1686_v9 = vmul.f32 %v1684_v16, %v3164_v41  ;;  %v1689_v41 = vmul.f32 %v3075_v28, %v1688_v40  ;;  %v1743_v16 = vstv %s1742_s18 }
 0x18a   : > { %v1703_v36 = vrot.slane %v1702_v38, 1  ;;  %v1654_v4 = vadd.f32 %v1653_v26, %v1612_v19  ;;  %vm1753_vm9 = vcmp.lt.s32.totalorder %v3413_v8, 256 }
 0x18b   : > { %v1672_v56 = vsel %vm1662_vm4, %v1670_v55, %v1671_v10  ;;  %v1687_v58 = vadd.f32 %v1686_v9, %v1645_v45 }
 0x18c   : > { %v1691_v59 = vpop.permute.xlu1 %1690  ;;  %v1705_v33 = vsel %vm1704_vm7, %v1702_v38, %v1703_v36  ;;  %v1674_v24 = vmul.f32 %v1672_v56, %v3412_v13 }
 0x18d   : > { %v1692_v31 = vrot.slane %v1691_v59, 1  ;;  %v1707_v23 = vmul.f32 %v1705_v33, %v1700_v30  ;;  %v1723_v11 = vpop.permute.xlu0 %1722 }
 0x18e   : > { %v1724_v39 = vrot.slane %v1723_v11, 1  ;;  %v1675_v54 = vadd.f32 %v1674_v24, %v1633_v27 }
 0x18f   : > { %v1693_v37 = vsel %vm1683_vm6, %v1691_v59, %v1692_v31  ;;  %v1708_v62 = vadd.f32 %v1707_v23, %v1666_v7 }
 0x190   : > { %v1712_v3 = vpop.permute.xlu1 %1711  ;;  %v1726_v44 = vsel %vm1725_vm8, %v1723_v11, %v1724_v39  ;;  %v1695_v60 = vmul.f32 %v1693_v37, %v1689_v41 }
 0x191   : > { %v1713_v20 = vrot.slane %v1712_v3, 1  ;;  %v1728_v30 = vmul.f32 %v1726_v44, %v1721_v32 }
 0x192   : > { %v1696_v63 = vadd.f32 %v1695_v60, %v1654_v4 }
 0x193   : > { %v1714_v17 = vsel %vm1704_vm7, %v1712_v3, %v1713_v20  ;;  %v1729_v57 = vadd.f32 %v1728_v30, %v1687_v58 }
 0x194   : > { %v1716_v25 = vmul.f32 %v1714_v17, %v1710_v51  ;;  %v1733_v52 = vpop.permute.xlu1 %1732 }
 0x195   : > { %v1734_v46 = vrot.slane %v1733_v52, 1  ;;  %v1739_v42 = vadd.f32 %v1729_v57, %v1708_v62 }
 0x196   : > { %v1717_v5 = vadd.f32 %v1716_v25, %v1675_v54 }
 0x197   : > { %v471_v22 = vpop.f32.mrf.mxu0  ;;  %v1735_v61 = vsel %vm1725_vm8, %v1733_v52, %v1734_v46 }
 0x198   : > { %v475_v2 = vmax.f32 %v471_v22, 0.0  ;;  %v1737_v0 = vmul.f32 %v1735_v61, %v1731_v1 }
 0x199   : > { %v2005_v18 = vpop.f32.mrf.mxu0 }
 0x19a   : > { %2009 = vmatmul.mubr.msk.f32.vlgmr.msra.gmra.mxu1 %vm476_vm0, %v475_v2  ;;  %v1738_v14 = vadd.f32 %v1737_v0, %v1696_v63  ;;  %vm564_vm0 = vcmask 253952  }
 0x19c   : > { %v1740_v55 = vadd.f32 %v1738_v14, %v1717_v5 }
 0x19e   : > { %v1741_v12 = vadd.f32 %v1740_v55, %v1739_v42 }
 0x1a0   : > { %v1744_v28 = vadd.f32 %v1743_v16, %v1741_v12 }
 0x1a2   : > { %v1983_v6 = vmul.f32 -1.442695, %v1744_v28 }
 0x1a4   : > { %2112 = vpow2.f32 %v1983_v6 }
 0x1b1   : > { %v2113_v48 = vpop.eup %2112 }
 0x1b2   : > { %v1748_v10 = vadd.f32 1.0, %v2113_v48 }
 0x1b4   : > { %2114 = vrcp.f32 %v1748_v10 }
 0x1c1   : > { %v2115_v38 = vpop.eup %2114 }
 0x1c2   : > { %1755 = vst.msk [vmem:[%s301_s22] sm:$0x3] %vm1753_vm9, %v2115_v38 }
 0x25a   : > { %v550_v50 = vpop.f32.mrf.mxu1 }
 0x25b   : > { %v555_v35 = vrot.slane %v550_v50, 1 }
 0x25c   : > { %v2010_v21 = vpop.f32.mrf.mxu1 }
 0x25d   : > { %v557_v40 = vadd.f32 %v555_v35, %v550_v50 }
 0x25f   : > { %v1879_v36 = vmul.f32 -1.442695, %v557_v40 }
 0x261   : > { %2116 = vpow2.f32 %v1879_v36 }
 0x26e   : > { %v2117_v49 = vpop.eup %2116 }
 0x26f   : > { %v561_v45 = vadd.f32 1.0, %v2117_v49 }
 0x271   : > { %2118 = vrcp.f32 %v561_v45 }
 0x27e   : > { %v2119_v9 = vpop.eup %2118 }
 0x27f   : > { %565 = vst.msk [vmem:[%s286_s25] sm:$0x1] %vm564_vm0, %v2119_v9 }
 0x280   : > { %2148 = shalt.err (!%p2145_p2)
}
 0x281   : > { %s2149_s4 = scalar_lea.hbm %s3320_s15, 16  ;;  %s2153_s28 = scalar_lea.hbm %s3414_s14, 32 }
 0x282   : > { %p2150_p3 = scmp.ne.s32.totalorder %s3320_s15, %s2149_s4  ;;  %p2154_p8 = scmp.lt.s32.totalorder %s3320_s15, %s3414_s14 }
 0x283   : > { %p2155_p11 = scmp.lt.s32.totalorder %s2153_s28, %s2149_s4 }
 0x284   : > { %p2151_p4 = pnand %p2150_p3, %p2335_p5 }
 0x285   : > { %p2156_p9 = por %p2155_p11, %p2154_p8 }
 0x286   : > { %p2152_p7 = pneg %p2151_p4 }
 0x288   : > { %p2157_p10 = pnand %p2156_p9, %p2152_p7 }
 0x28a   : > { %2160 = shalt.err (!%p2157_p10)
}
 0x28b   : > { %2015 = dma.vmem_to_hbm [thread:$0]  (%p2335_p5), %s1774_s30, 16, %s3320_s15, %s1757_s16  }
 0x28c PF: > { %s3415_s11 = sld [smem:[#allocation11_spill]] }
 0x28d   : > { %s3416_s13 = sld [smem:[#allocation9_spill]] }
 0x292   : > { %p2027_p12 = scmp.ge.s32.totalorder %s3415_s11, 2 }
 0x293   : > { %s1788_s18 = sand.u32 1, %s3416_s13  }
 0x294   : > { %p2022_p13 = pnand %p2027_p12, %p2339_p6  ;;  %s1789_s19 = scalar_lea.sflag [#allocation4], %s1788_s18 }
 0x296   : > { %p2023_p0 = pneg %p2022_p13 }
 0x298   : > { %2182 = dma.done.wait (%p2023_p0), %s1789_s19, 16  }
 0x299   : > { %2184 = vsyncadd (%p2023_p0), %s1789_s19, 4294967280  ;;  %s3418_s29 = sld [smem:[#allocation12_spill]]  ;;  %s3421_s26 = smov %s2191_s27 }
 0x29a   : > { %s3419_s23 = sld [smem:[#allocation10_spill]] }
 0x29b   : > { %s3420_s28 = sld [smem:[#allocation13_spill]] }
 0x29f   : > { %p20_p1 = scmp.ge.s32.totalorder %s3418_s29, 4  }
 0x2a0   : > { %s3422_s27 = smov %s3419_s23 }
 0x2a1   :  { %22 = sbr.rel (!%p20_p1) target bundleno = 11 (0xb), region = 102 }
 0x2a6   :  { %1800 = vsyncpa [#allocation4], 1 }
 0x2a7   :  { %1802 = vsyncpa [#allocation4 + $0x1], 1 }
 0x2a8   :  { %1803 = vsyncpa [#allocation5], 1 }
 0x2a9   :  { %1805 = vsyncpa [#allocation5 + $0x1], 1 }

</bundles_post_ra>
